<compile_context>
chip_gen: v6e
topology: v6e:2x2x1
jax: 0.10.0
libtpu: 0.0.40
codegen_flags: <defaults>
</compile_context>

<pallas_src>
import functools

import jax
import jax.numpy as jnp
from jax import lax
from jax.experimental import pallas as pl
from jax.experimental.pallas import tpu as pltpu


def lstm_fc_kernel(x_ref, wih_ref, whh_ref, b_ref, wfc_ref, bfc_ref, out_ref):
    """x_ref:   (T*Bp, D)  time-major flattened input (batch padded to Bp)
    wih_ref: (D, 4G)    input->gate weights, gate blocks lane-padded to G
    whh_ref: (G, 4G)    hidden->gate weights (rows padded to G)
    b_ref:   (1, 4G)    combined bias (b_ih + b_hh), lane-padded
    wfc_ref: (G, Op)    fc weights (rows padded, cols lane-padded)
    bfc_ref: (1, Op)    fc bias
    out_ref: (Bp, Op)   final output"""
    Bp = out_ref.shape[0]
    G = whh_ref.shape[0]
    T = x_ref.shape[0] // Bp

    # Hoisted input projection for every timestep at once (one MXU pass).
    xg = (jnp.dot(x_ref[...], wih_ref[...],
                  preferred_element_type=jnp.float32) + b_ref[...])

    whh = whh_ref[...]
    h = jnp.zeros((Bp, G), jnp.float32)
    c = jnp.zeros((Bp, G), jnp.float32)

    # Fully-unrolled static recurrence (T small & static).  Only h @ W_hh
    # is on the serial chain; slices of xg are sublane-aligned (Bp == 8).
    for t in range(T):
        gates = xg[t * Bp:(t + 1) * Bp, :] + jnp.dot(
            h, whh, preferred_element_type=jnp.float32)
        # PyTorch gate order: input, forget, cell (g), output.
        # Each gate is a full 128-lane tile -> lane-aligned static slices.
        i_g = jax.nn.sigmoid(gates[:, 0 * G:1 * G])
        f_g = jax.nn.sigmoid(gates[:, 1 * G:2 * G])
        g_g = jnp.tanh(gates[:, 2 * G:3 * G])
        o_g = jax.nn.sigmoid(gates[:, 3 * G:4 * G])
        c = f_g * c + i_g * g_g
        h = o_g * jnp.tanh(c)

    # fc on the last hidden state; lane-dense (Bp, Op) unmasked store.
    out_ref[...] = (jnp.dot(h, wfc_ref[...],
                            preferred_element_type=jnp.float32)
                    + bfc_ref[...])


def _round_up(v, m):
    return ((v + m - 1) // m) * m


def pack_params(params):
    """One-time repacking of PyTorch-shaped weights into padded, gate-tiled,
    MXU-friendly layouts.  Done outside the jitted forward so it never sits
    on the steady-state path."""
    H = params["weight_hh_l0"].shape[1]
    O = params["fc_weight"].shape[0]
    G = _round_up(H, 128)        # per-gate width padded to one lane tile
    Op = _round_up(O, 128)       # fc output width padded to one lane tile

    def pack_gates(w_t):
        # (K, 4H) -> (K, 4G): each gate block zero-padded to G lanes.
        K = w_t.shape[0]
        out = jnp.zeros((K, 4 * G), jnp.float32)
        for g in range(4):
            out = out.at[:, g * G:g * G + H].set(w_t[:, g * H:(g + 1) * H])
        return out

    wih_p = pack_gates(params["weight_ih_l0"].T.astype(jnp.float32))   # (D, 4G)
    whh_p = jnp.zeros((G, 4 * G), jnp.float32).at[:H].set(
        pack_gates(params["weight_hh_l0"].T.astype(jnp.float32)))      # (G, 4G)
    bias = (params["bias_ih_l0"] + params["bias_hh_l0"]).reshape(1, 4 * H)
    bias_p = pack_gates(bias.astype(jnp.float32))                      # (1, 4G)
    wfc_p = jnp.zeros((G, Op), jnp.float32).at[:H, :O].set(
        params["fc_weight"].T.astype(jnp.float32))                     # (G, Op)
    bfc_p = jnp.zeros((1, Op), jnp.float32).at[:, :O].set(
        params["fc_bias"].reshape(1, O).astype(jnp.float32))           # (1, Op)

    return {"wih": wih_p, "whh": whh_p, "b": bias_p,
            "wfc": wfc_p, "bfc": bfc_p, "H": H, "O": O}


@functools.partial(jax.jit, static_argnames=("out_dim",))
def _forward_packed(x_btd, wih, whh, b, wfc, bfc, out_dim):
    B, T, D = x_btd.shape
    Bp = _round_up(B, 8)         # batch padded to the sublane count

    x_btd = x_btd.astype(jnp.float32)
    # Pad batch with zero rows, go time-major, flatten to (T*Bp, D).
    x_pad = jnp.zeros((Bp, T, D), jnp.float32).at[:B].set(x_btd)
    x_flat = jnp.transpose(x_pad, (1, 0, 2)).reshape(T * Bp, D)

    Op = wfc.shape[1]
    vmem = pl.BlockSpec(memory_space=pltpu.MemorySpace.VMEM)
    out_pad = pl.pallas_call(
        lstm_fc_kernel,
        out_shape=jax.ShapeDtypeStruct((Bp, Op), jnp.float32),
        in_specs=[vmem] * 6,
        out_specs=vmem,
    )(x_flat, wih, whh, b, wfc, bfc)
    # TODO(synk): at large B, add a "parallel" batch-tile grid axis so the
    # second TensorCore (v7x) processes half the batch; unnecessary at B=2.
    return out_pad[:B, :out_dim]


def data_management_lstm_forward(x_btd, params):
    """x_btd: (B, T, D_in) float32 (batch-first, like PyTorch).
    params: dict with PyTorch-shaped weights."""
    packed = pack_params(params)
    return _forward_packed(x_btd, packed["wih"], packed["whh"], packed["b"],
                           packed["wfc"], packed["bfc"], packed["O"])


def reference_forward(x_btd, params):
    """Pure-JAX reference of the same forward pass."""
    B, T, D = x_btd.shape
    H = params["weight_hh_l0"].shape[1]
    wih_t = params["weight_ih_l0"].T
    whh_t = params["weight_hh_l0"].T
    bias = params["bias_ih_l0"] + params["bias_hh_l0"]

    def step(carry, x_t):
        h, c = carry
        gates = x_t @ wih_t + h @ whh_t + bias
        i = jax.nn.sigmoid(gates[:, 0 * H:1 * H])
        f = jax.nn.sigmoid(gates[:, 1 * H:2 * H])
        g = jnp.tanh(gates[:, 2 * H:3 * H])
        o = jax.nn.sigmoid(gates[:, 3 * H:4 * H])
        c = f * c + i * g
        h = o * jnp.tanh(c)
        return (h, c), None

    h0 = jnp.zeros((B, H), jnp.float32)
    c0 = jnp.zeros((B, H), jnp.float32)
    (h_T, _), _ = lax.scan(step, (h0, c0), jnp.transpose(x_btd, (1, 0, 2)))
    return h_T @ params["fc_weight"].T + params["fc_bias"]


def init_params(key, input_dim, hidden_dim, output_dim):
    """Deterministic parameter init matching PyTorch shapes
    (uniform(-1/sqrt(H), 1/sqrt(H)), like nn.LSTM / nn.Linear defaults)."""
    ks = jax.random.split(key, 6)
    s = 1.0 / jnp.sqrt(hidden_dim)
    u = lambda k, shape: jax.random.uniform(k, shape, jnp.float32, -s, s)
    return {
        "weight_ih_l0": u(ks[0], (4 * hidden_dim, input_dim)),
        "weight_hh_l0": u(ks[1], (4 * hidden_dim, hidden_dim)),
        "bias_ih_l0": u(ks[2], (4 * hidden_dim,)),
        "bias_hh_l0": u(ks[3], (4 * hidden_dim,)),
        "fc_weight": u(ks[4], (output_dim, hidden_dim)),
        "fc_bias": u(ks[5], (output_dim,)),
    }


if __name__ == "__main__":
    # config: input_dim=16, hidden_dim=32, output_dim=8, num_layers=1,
    # bidirectional=False, dropout=0.0, attention=None, residual=False
    B, T, D_IN, H, O = 2, 8, 16, 32, 8

    key = jax.random.PRNGKey(0)
    k_x, k_p = jax.random.split(key)
    x = jax.random.normal(k_x, (B, T, D_IN), dtype=jnp.float32)
    params = init_params(k_p, D_IN, H, O)

    y = data_management_lstm_forward(x, params)
    y = jax.block_until_ready(y)

    y_ref = reference_forward(x, params)
    assert y.shape == (B, O)
    assert jnp.allclose(y, y_ref, atol=1e-5, rtol=1e-5), "mismatch vs reference"

    # TODO(synk): attention ('self'/'luong'), residual, and dropout branches
    # are disabled in the default config and not implemented in the kernel.
    print("KERNEL_OK")
</pallas_src>

<mosaic_0001>
module attributes {stable_mosaic.version = 11 : i64} {
  func.func @lstm_fc_kernel(%arg0: memref<64x16xf32, #tpu.memory_space<vmem>>, %arg1: memref<16x512xf32, #tpu.memory_space<vmem>>, %arg2: memref<128x512xf32, #tpu.memory_space<vmem>>, %arg3: memref<1x512xf32, #tpu.memory_space<vmem>>, %arg4: memref<128x128xf32, #tpu.memory_space<vmem>>, %arg5: memref<1x128xf32, #tpu.memory_space<vmem>>, %arg6: memref<8x128xf32, #tpu.memory_space<vmem>>) attributes {dimension_semantics = [], scalar_prefetch = 0 : i64, scratch_operands = 0 : i64, tpu.core_type = #tpu.core_type<tc>} {
    %c0 = arith.constant 0 : index
    %c0_0 = arith.constant 0 : index
    %0 = vector.load %arg0[%c0, %c0_0] : memref<64x16xf32, #tpu.memory_space<vmem>>, vector<64x16xf32>
    %c0_1 = arith.constant 0 : index
    %c0_2 = arith.constant 0 : index
    %1 = vector.load %arg1[%c0_1, %c0_2] : memref<16x512xf32, #tpu.memory_space<vmem>>, vector<16x512xf32>
    %cst = arith.constant dense<0.000000e+00> : vector<64x512xf32>
    %2 = tpu.matmul %0, %1, %cst {dimension_numbers = #tpu.dot_dimension_numbers<[1], [0], [0], [1], [0, 0, 1, 1], [], []>} : vector<64x16xf32>, vector<16x512xf32>, vector<64x512xf32> -> vector<64x512xf32>
    %c0_3 = arith.constant 0 : index
    %c0_4 = arith.constant 0 : index
    %3 = vector.load %arg3[%c0_3, %c0_4] : memref<1x512xf32, #tpu.memory_space<vmem>>, vector<1x512xf32>
    %4 = vector.broadcast %3 : vector<1x512xf32> to vector<64x512xf32>
    %5 = arith.addf %2, %4 : vector<64x512xf32>
    %c0_5 = arith.constant 0 : index
    %c0_6 = arith.constant 0 : index
    %6 = vector.load %arg2[%c0_5, %c0_6] : memref<128x512xf32, #tpu.memory_space<vmem>>, vector<128x512xf32>
    %cst_7 = arith.constant 0.000000e+00 : f32
    %7 = vector.broadcast %cst_7 : f32 to vector<8x128xf32>
    %cst_8 = arith.constant 0.000000e+00 : f32
    %8 = vector.broadcast %cst_8 : f32 to vector<8x128xf32>
    %9 = vector.extract_strided_slice %5 {offsets = [0, 0], sizes = [8, 512], strides = [1, 1]} : vector<64x512xf32> to vector<8x512xf32>
    %cst_9 = arith.constant dense<0.000000e+00> : vector<8x512xf32>
    %10 = tpu.matmul %7, %6, %cst_9 {dimension_numbers = #tpu.dot_dimension_numbers<[1], [0], [0], [1], [0, 0, 1, 1], [], []>} : vector<8x128xf32>, vector<128x512xf32>, vector<8x512xf32> -> vector<8x512xf32>
    %11 = arith.addf %9, %10 : vector<8x512xf32>
    %12 = vector.extract_strided_slice %11 {offsets = [0, 0], sizes = [8, 128], strides = [1, 1]} : vector<8x512xf32> to vector<8x128xf32>
    %13 = arith.negf %12 : vector<8x128xf32>
    %14 = math.exp %13 : vector<8x128xf32>
    %cst_10 = arith.constant 1.000000e+00 : f32
    %15 = vector.broadcast %cst_10 : f32 to vector<8x128xf32>
    %16 = arith.addf %15, %14 : vector<8x128xf32>
    %17 = arith.divf %15, %16 : vector<8x128xf32>
    %18 = vector.extract_strided_slice %11 {offsets = [0, 128], sizes = [8, 128], strides = [1, 1]} : vector<8x512xf32> to vector<8x128xf32>
    %19 = arith.negf %18 : vector<8x128xf32>
    %20 = math.exp %19 : vector<8x128xf32>
    %cst_11 = arith.constant 1.000000e+00 : f32
    %21 = vector.broadcast %cst_11 : f32 to vector<8x128xf32>
    %22 = arith.addf %21, %20 : vector<8x128xf32>
    %23 = arith.divf %21, %22 : vector<8x128xf32>
    %24 = vector.extract_strided_slice %11 {offsets = [0, 256], sizes = [8, 128], strides = [1, 1]} : vector<8x512xf32> to vector<8x128xf32>
    %25 = math.tanh %24 : vector<8x128xf32>
    %26 = vector.extract_strided_slice %11 {offsets = [0, 384], sizes = [8, 128], strides = [1, 1]} : vector<8x512xf32> to vector<8x128xf32>
    %27 = arith.negf %26 : vector<8x128xf32>
    %28 = math.exp %27 : vector<8x128xf32>
    %cst_12 = arith.constant 1.000000e+00 : f32
    %29 = vector.broadcast %cst_12 : f32 to vector<8x128xf32>
    %30 = arith.addf %29, %28 : vector<8x128xf32>
    %31 = arith.divf %29, %30 : vector<8x128xf32>
    %32 = arith.mulf %23, %8 : vector<8x128xf32>
    %33 = arith.mulf %17, %25 : vector<8x128xf32>
    %34 = arith.addf %32, %33 : vector<8x128xf32>
    %35 = math.tanh %34 : vector<8x128xf32>
    %36 = arith.mulf %31, %35 : vector<8x128xf32>
    %37 = vector.extract_strided_slice %5 {offsets = [8, 0], sizes = [8, 512], strides = [1, 1]} : vector<64x512xf32> to vector<8x512xf32>
    %cst_13 = arith.constant dense<0.000000e+00> : vector<8x512xf32>
    %38 = tpu.matmul %36, %6, %cst_13 {dimension_numbers = #tpu.dot_dimension_numbers<[1], [0], [0], [1], [0, 0, 1, 1], [], []>} : vector<8x128xf32>, vector<128x512xf32>, vector<8x512xf32> -> vector<8x512xf32>
    %39 = arith.addf %37, %38 : vector<8x512xf32>
    %40 = vector.extract_strided_slice %39 {offsets = [0, 0], sizes = [8, 128], strides = [1, 1]} : vector<8x512xf32> to vector<8x128xf32>
    %41 = arith.negf %40 : vector<8x128xf32>
    %42 = math.exp %41 : vector<8x128xf32>
    %cst_14 = arith.constant 1.000000e+00 : f32
    %43 = vector.broadcast %cst_14 : f32 to vector<8x128xf32>
    %44 = arith.addf %43, %42 : vector<8x128xf32>
    %45 = arith.divf %43, %44 : vector<8x128xf32>
    %46 = vector.extract_strided_slice %39 {offsets = [0, 128], sizes = [8, 128], strides = [1, 1]} : vector<8x512xf32> to vector<8x128xf32>
    %47 = arith.negf %46 : vector<8x128xf32>
    %48 = math.exp %47 : vector<8x128xf32>
    %cst_15 = arith.constant 1.000000e+00 : f32
    %49 = vector.broadcast %cst_15 : f32 to vector<8x128xf32>
    %50 = arith.addf %49, %48 : vector<8x128xf32>
    %51 = arith.divf %49, %50 : vector<8x128xf32>
    %52 = vector.extract_strided_slice %39 {offsets = [0, 256], sizes = [8, 128], strides = [1, 1]} : vector<8x512xf32> to vector<8x128xf32>
    %53 = math.tanh %52 : vector<8x128xf32>
    %54 = vector.extract_strided_slice %39 {offsets = [0, 384], sizes = [8, 128], strides = [1, 1]} : vector<8x512xf32> to vector<8x128xf32>
    %55 = arith.negf %54 : vector<8x128xf32>
    %56 = math.exp %55 : vector<8x128xf32>
    %cst_16 = arith.constant 1.000000e+00 : f32
    %57 = vector.broadcast %cst_16 : f32 to vector<8x128xf32>
    %58 = arith.addf %57, %56 : vector<8x128xf32>
    %59 = arith.divf %57, %58 : vector<8x128xf32>
    %60 = arith.mulf %51, %34 : vector<8x128xf32>
    %61 = arith.mulf %45, %53 : vector<8x128xf32>
    %62 = arith.addf %60, %61 : vector<8x128xf32>
    %63 = math.tanh %62 : vector<8x128xf32>
    %64 = arith.mulf %59, %63 : vector<8x128xf32>
    %65 = vector.extract_strided_slice %5 {offsets = [16, 0], sizes = [8, 512], strides = [1, 1]} : vector<64x512xf32> to vector<8x512xf32>
    %cst_17 = arith.constant dense<0.000000e+00> : vector<8x512xf32>
    %66 = tpu.matmul %64, %6, %cst_17 {dimension_numbers = #tpu.dot_dimension_numbers<[1], [0], [0], [1], [0, 0, 1, 1], [], []>} : vector<8x128xf32>, vector<128x512xf32>, vector<8x512xf32> -> vector<8x512xf32>
    %67 = arith.addf %65, %66 : vector<8x512xf32>
    %68 = vector.extract_strided_slice %67 {offsets = [0, 0], sizes = [8, 128], strides = [1, 1]} : vector<8x512xf32> to vector<8x128xf32>
    %69 = arith.negf %68 : vector<8x128xf32>
    %70 = math.exp %69 : vector<8x128xf32>
    %cst_18 = arith.constant 1.000000e+00 : f32
    %71 = vector.broadcast %cst_18 : f32 to vector<8x128xf32>
    %72 = arith.addf %71, %70 : vector<8x128xf32>
    %73 = arith.divf %71, %72 : vector<8x128xf32>
    %74 = vector.extract_strided_slice %67 {offsets = [0, 128], sizes = [8, 128], strides = [1, 1]} : vector<8x512xf32> to vector<8x128xf32>
    %75 = arith.negf %74 : vector<8x128xf32>
    %76 = math.exp %75 : vector<8x128xf32>
    %cst_19 = arith.constant 1.000000e+00 : f32
    %77 = vector.broadcast %cst_19 : f32 to vector<8x128xf32>
    %78 = arith.addf %77, %76 : vector<8x128xf32>
    %79 = arith.divf %77, %78 : vector<8x128xf32>
    %80 = vector.extract_strided_slice %67 {offsets = [0, 256], sizes = [8, 128], strides = [1, 1]} : vector<8x512xf32> to vector<8x128xf32>
    %81 = math.tanh %80 : vector<8x128xf32>
    %82 = vector.extract_strided_slice %67 {offsets = [0, 384], sizes = [8, 128], strides = [1, 1]} : vector<8x512xf32> to vector<8x128xf32>
    %83 = arith.negf %82 : vector<8x128xf32>
    %84 = math.exp %83 : vector<8x128xf32>
    %cst_20 = arith.constant 1.000000e+00 : f32
    %85 = vector.broadcast %cst_20 : f32 to vector<8x128xf32>
    %86 = arith.addf %85, %84 : vector<8x128xf32>
    %87 = arith.divf %85, %86 : vector<8x128xf32>
    %88 = arith.mulf %79, %62 : vector<8x128xf32>
    %89 = arith.mulf %73, %81 : vector<8x128xf32>
    %90 = arith.addf %88, %89 : vector<8x128xf32>
    %91 = math.tanh %90 : vector<8x128xf32>
    %92 = arith.mulf %87, %91 : vector<8x128xf32>
    %93 = vector.extract_strided_slice %5 {offsets = [24, 0], sizes = [8, 512], strides = [1, 1]} : vector<64x512xf32> to vector<8x512xf32>
    %cst_21 = arith.constant dense<0.000000e+00> : vector<8x512xf32>
    %94 = tpu.matmul %92, %6, %cst_21 {dimension_numbers = #tpu.dot_dimension_numbers<[1], [0], [0], [1], [0, 0, 1, 1], [], []>} : vector<8x128xf32>, vector<128x512xf32>, vector<8x512xf32> -> vector<8x512xf32>
    %95 = arith.addf %93, %94 : vector<8x512xf32>
    %96 = vector.extract_strided_slice %95 {offsets = [0, 0], sizes = [8, 128], strides = [1, 1]} : vector<8x512xf32> to vector<8x128xf32>
    %97 = arith.negf %96 : vector<8x128xf32>
    %98 = math.exp %97 : vector<8x128xf32>
    %cst_22 = arith.constant 1.000000e+00 : f32
    %99 = vector.broadcast %cst_22 : f32 to vector<8x128xf32>
    %100 = arith.addf %99, %98 : vector<8x128xf32>
    %101 = arith.divf %99, %100 : vector<8x128xf32>
    %102 = vector.extract_strided_slice %95 {offsets = [0, 128], sizes = [8, 128], strides = [1, 1]} : vector<8x512xf32> to vector<8x128xf32>
    %103 = arith.negf %102 : vector<8x128xf32>
    %104 = math.exp %103 : vector<8x128xf32>
    %cst_23 = arith.constant 1.000000e+00 : f32
    %105 = vector.broadcast %cst_23 : f32 to vector<8x128xf32>
    %106 = arith.addf %105, %104 : vector<8x128xf32>
    %107 = arith.divf %105, %106 : vector<8x128xf32>
    %108 = vector.extract_strided_slice %95 {offsets = [0, 256], sizes = [8, 128], strides = [1, 1]} : vector<8x512xf32> to vector<8x128xf32>
    %109 = math.tanh %108 : vector<8x128xf32>
    %110 = vector.extract_strided_slice %95 {offsets = [0, 384], sizes = [8, 128], strides = [1, 1]} : vector<8x512xf32> to vector<8x128xf32>
    %111 = arith.negf %110 : vector<8x128xf32>
    %112 = math.exp %111 : vector<8x128xf32>
    %cst_24 = arith.constant 1.000000e+00 : f32
    %113 = vector.broadcast %cst_24 : f32 to vector<8x128xf32>
    %114 = arith.addf %113, %112 : vector<8x128xf32>
    %115 = arith.divf %113, %114 : vector<8x128xf32>
    %116 = arith.mulf %107, %90 : vector<8x128xf32>
    %117 = arith.mulf %101, %109 : vector<8x128xf32>
    %118 = arith.addf %116, %117 : vector<8x128xf32>
    %119 = math.tanh %118 : vector<8x128xf32>
    %120 = arith.mulf %115, %119 : vector<8x128xf32>
    %121 = vector.extract_strided_slice %5 {offsets = [32, 0], sizes = [8, 512], strides = [1, 1]} : vector<64x512xf32> to vector<8x512xf32>
    %cst_25 = arith.constant dense<0.000000e+00> : vector<8x512xf32>
    %122 = tpu.matmul %120, %6, %cst_25 {dimension_numbers = #tpu.dot_dimension_numbers<[1], [0], [0], [1], [0, 0, 1, 1], [], []>} : vector<8x128xf32>, vector<128x512xf32>, vector<8x512xf32> -> vector<8x512xf32>
    %123 = arith.addf %121, %122 : vector<8x512xf32>
    %124 = vector.extract_strided_slice %123 {offsets = [0, 0], sizes = [8, 128], strides = [1, 1]} : vector<8x512xf32> to vector<8x128xf32>
    %125 = arith.negf %124 : vector<8x128xf32>
    %126 = math.exp %125 : vector<8x128xf32>
    %cst_26 = arith.constant 1.000000e+00 : f32
    %127 = vector.broadcast %cst_26 : f32 to vector<8x128xf32>
    %128 = arith.addf %127, %126 : vector<8x128xf32>
    %129 = arith.divf %127, %128 : vector<8x128xf32>
    %130 = vector.extract_strided_slice %123 {offsets = [0, 128], sizes = [8, 128], strides = [1, 1]} : vector<8x512xf32> to vector<8x128xf32>
    %131 = arith.negf %130 : vector<8x128xf32>
    %132 = math.exp %131 : vector<8x128xf32>
    %cst_27 = arith.constant 1.000000e+00 : f32
    %133 = vector.broadcast %cst_27 : f32 to vector<8x128xf32>
    %134 = arith.addf %133, %132 : vector<8x128xf32>
    %135 = arith.divf %133, %134 : vector<8x128xf32>
    %136 = vector.extract_strided_slice %123 {offsets = [0, 256], sizes = [8, 128], strides = [1, 1]} : vector<8x512xf32> to vector<8x128xf32>
    %137 = math.tanh %136 : vector<8x128xf32>
    %138 = vector.extract_strided_slice %123 {offsets = [0, 384], sizes = [8, 128], strides = [1, 1]} : vector<8x512xf32> to vector<8x128xf32>
    %139 = arith.negf %138 : vector<8x128xf32>
    %140 = math.exp %139 : vector<8x128xf32>
    %cst_28 = arith.constant 1.000000e+00 : f32
    %141 = vector.broadcast %cst_28 : f32 to vector<8x128xf32>
    %142 = arith.addf %141, %140 : vector<8x128xf32>
    %143 = arith.divf %141, %142 : vector<8x128xf32>
    %144 = arith.mulf %135, %118 : vector<8x128xf32>
    %145 = arith.mulf %129, %137 : vector<8x128xf32>
    %146 = arith.addf %144, %145 : vector<8x128xf32>
    %147 = math.tanh %146 : vector<8x128xf32>
    %148 = arith.mulf %143, %147 : vector<8x128xf32>
    %149 = vector.extract_strided_slice %5 {offsets = [40, 0], sizes = [8, 512], strides = [1, 1]} : vector<64x512xf32> to vector<8x512xf32>
    %cst_29 = arith.constant dense<0.000000e+00> : vector<8x512xf32>
    %150 = tpu.matmul %148, %6, %cst_29 {dimension_numbers = #tpu.dot_dimension_numbers<[1], [0], [0], [1], [0, 0, 1, 1], [], []>} : vector<8x128xf32>, vector<128x512xf32>, vector<8x512xf32> -> vector<8x512xf32>
    %151 = arith.addf %149, %150 : vector<8x512xf32>
    %152 = vector.extract_strided_slice %151 {offsets = [0, 0], sizes = [8, 128], strides = [1, 1]} : vector<8x512xf32> to vector<8x128xf32>
    %153 = arith.negf %152 : vector<8x128xf32>
    %154 = math.exp %153 : vector<8x128xf32>
    %cst_30 = arith.constant 1.000000e+00 : f32
    %155 = vector.broadcast %cst_30 : f32 to vector<8x128xf32>
    %156 = arith.addf %155, %154 : vector<8x128xf32>
    %157 = arith.divf %155, %156 : vector<8x128xf32>
    %158 = vector.extract_strided_slice %151 {offsets = [0, 128], sizes = [8, 128], strides = [1, 1]} : vector<8x512xf32> to vector<8x128xf32>
    %159 = arith.negf %158 : vector<8x128xf32>
    %160 = math.exp %159 : vector<8x128xf32>
    %cst_31 = arith.constant 1.000000e+00 : f32
    %161 = vector.broadcast %cst_31 : f32 to vector<8x128xf32>
    %162 = arith.addf %161, %160 : vector<8x128xf32>
    %163 = arith.divf %161, %162 : vector<8x128xf32>
    %164 = vector.extract_strided_slice %151 {offsets = [0, 256], sizes = [8, 128], strides = [1, 1]} : vector<8x512xf32> to vector<8x128xf32>
    %165 = math.tanh %164 : vector<8x128xf32>
    %166 = vector.extract_strided_slice %151 {offsets = [0, 384], sizes = [8, 128], strides = [1, 1]} : vector<8x512xf32> to vector<8x128xf32>
    %167 = arith.negf %166 : vector<8x128xf32>
    %168 = math.exp %167 : vector<8x128xf32>
    %cst_32 = arith.constant 1.000000e+00 : f32
    %169 = vector.broadcast %cst_32 : f32 to vector<8x128xf32>
    %170 = arith.addf %169, %168 : vector<8x128xf32>
    %171 = arith.divf %169, %170 : vector<8x128xf32>
    %172 = arith.mulf %163, %146 : vector<8x128xf32>
    %173 = arith.mulf %157, %165 : vector<8x128xf32>
    %174 = arith.addf %172, %173 : vector<8x128xf32>
    %175 = math.tanh %174 : vector<8x128xf32>
    %176 = arith.mulf %171, %175 : vector<8x128xf32>
    %177 = vector.extract_strided_slice %5 {offsets = [48, 0], sizes = [8, 512], strides = [1, 1]} : vector<64x512xf32> to vector<8x512xf32>
    %cst_33 = arith.constant dense<0.000000e+00> : vector<8x512xf32>
    %178 = tpu.matmul %176, %6, %cst_33 {dimension_numbers = #tpu.dot_dimension_numbers<[1], [0], [0], [1], [0, 0, 1, 1], [], []>} : vector<8x128xf32>, vector<128x512xf32>, vector<8x512xf32> -> vector<8x512xf32>
    %179 = arith.addf %177, %178 : vector<8x512xf32>
    %180 = vector.extract_strided_slice %179 {offsets = [0, 0], sizes = [8, 128], strides = [1, 1]} : vector<8x512xf32> to vector<8x128xf32>
    %181 = arith.negf %180 : vector<8x128xf32>
    %182 = math.exp %181 : vector<8x128xf32>
    %cst_34 = arith.constant 1.000000e+00 : f32
    %183 = vector.broadcast %cst_34 : f32 to vector<8x128xf32>
    %184 = arith.addf %183, %182 : vector<8x128xf32>
    %185 = arith.divf %183, %184 : vector<8x128xf32>
    %186 = vector.extract_strided_slice %179 {offsets = [0, 128], sizes = [8, 128], strides = [1, 1]} : vector<8x512xf32> to vector<8x128xf32>
    %187 = arith.negf %186 : vector<8x128xf32>
    %188 = math.exp %187 : vector<8x128xf32>
    %cst_35 = arith.constant 1.000000e+00 : f32
    %189 = vector.broadcast %cst_35 : f32 to vector<8x128xf32>
    %190 = arith.addf %189, %188 : vector<8x128xf32>
    %191 = arith.divf %189, %190 : vector<8x128xf32>
    %192 = vector.extract_strided_slice %179 {offsets = [0, 256], sizes = [8, 128], strides = [1, 1]} : vector<8x512xf32> to vector<8x128xf32>
    %193 = math.tanh %192 : vector<8x128xf32>
    %194 = vector.extract_strided_slice %179 {offsets = [0, 384], sizes = [8, 128], strides = [1, 1]} : vector<8x512xf32> to vector<8x128xf32>
    %195 = arith.negf %194 : vector<8x128xf32>
    %196 = math.exp %195 : vector<8x128xf32>
    %cst_36 = arith.constant 1.000000e+00 : f32
    %197 = vector.broadcast %cst_36 : f32 to vector<8x128xf32>
    %198 = arith.addf %197, %196 : vector<8x128xf32>
    %199 = arith.divf %197, %198 : vector<8x128xf32>
    %200 = arith.mulf %191, %174 : vector<8x128xf32>
    %201 = arith.mulf %185, %193 : vector<8x128xf32>
    %202 = arith.addf %200, %201 : vector<8x128xf32>
    %203 = math.tanh %202 : vector<8x128xf32>
    %204 = arith.mulf %199, %203 : vector<8x128xf32>
    %205 = vector.extract_strided_slice %5 {offsets = [56, 0], sizes = [8, 512], strides = [1, 1]} : vector<64x512xf32> to vector<8x512xf32>
    %cst_37 = arith.constant dense<0.000000e+00> : vector<8x512xf32>
    %206 = tpu.matmul %204, %6, %cst_37 {dimension_numbers = #tpu.dot_dimension_numbers<[1], [0], [0], [1], [0, 0, 1, 1], [], []>} : vector<8x128xf32>, vector<128x512xf32>, vector<8x512xf32> -> vector<8x512xf32>
    %207 = arith.addf %205, %206 : vector<8x512xf32>
    %208 = vector.extract_strided_slice %207 {offsets = [0, 0], sizes = [8, 128], strides = [1, 1]} : vector<8x512xf32> to vector<8x128xf32>
    %209 = arith.negf %208 : vector<8x128xf32>
    %210 = math.exp %209 : vector<8x128xf32>
    %cst_38 = arith.constant 1.000000e+00 : f32
    %211 = vector.broadcast %cst_38 : f32 to vector<8x128xf32>
    %212 = arith.addf %211, %210 : vector<8x128xf32>
    %213 = arith.divf %211, %212 : vector<8x128xf32>
    %214 = vector.extract_strided_slice %207 {offsets = [0, 128], sizes = [8, 128], strides = [1, 1]} : vector<8x512xf32> to vector<8x128xf32>
    %215 = arith.negf %214 : vector<8x128xf32>
    %216 = math.exp %215 : vector<8x128xf32>
    %cst_39 = arith.constant 1.000000e+00 : f32
    %217 = vector.broadcast %cst_39 : f32 to vector<8x128xf32>
    %218 = arith.addf %217, %216 : vector<8x128xf32>
    %219 = arith.divf %217, %218 : vector<8x128xf32>
    %220 = vector.extract_strided_slice %207 {offsets = [0, 256], sizes = [8, 128], strides = [1, 1]} : vector<8x512xf32> to vector<8x128xf32>
    %221 = math.tanh %220 : vector<8x128xf32>
    %222 = vector.extract_strided_slice %207 {offsets = [0, 384], sizes = [8, 128], strides = [1, 1]} : vector<8x512xf32> to vector<8x128xf32>
    %223 = arith.negf %222 : vector<8x128xf32>
    %224 = math.exp %223 : vector<8x128xf32>
    %cst_40 = arith.constant 1.000000e+00 : f32
    %225 = vector.broadcast %cst_40 : f32 to vector<8x128xf32>
    %226 = arith.addf %225, %224 : vector<8x128xf32>
    %227 = arith.divf %225, %226 : vector<8x128xf32>
    %228 = arith.mulf %219, %202 : vector<8x128xf32>
    %229 = arith.mulf %213, %221 : vector<8x128xf32>
    %230 = arith.addf %228, %229 : vector<8x128xf32>
    %231 = math.tanh %230 : vector<8x128xf32>
    %232 = arith.mulf %227, %231 : vector<8x128xf32>
    %c0_41 = arith.constant 0 : index
    %c0_42 = arith.constant 0 : index
    %233 = vector.load %arg4[%c0_41, %c0_42] : memref<128x128xf32, #tpu.memory_space<vmem>>, vector<128x128xf32>
    %cst_43 = arith.constant dense<0.000000e+00> : vector<8x128xf32>
    %234 = tpu.matmul %232, %233, %cst_43 {dimension_numbers = #tpu.dot_dimension_numbers<[1], [0], [0], [1], [0, 0, 1, 1], [], []>} : vector<8x128xf32>, vector<128x128xf32>, vector<8x128xf32> -> vector<8x128xf32>
    %c0_44 = arith.constant 0 : index
    %c0_45 = arith.constant 0 : index
    %235 = vector.load %arg5[%c0_44, %c0_45] : memref<1x128xf32, #tpu.memory_space<vmem>>, vector<1x128xf32>
    %236 = vector.broadcast %235 : vector<1x128xf32> to vector<8x128xf32>
    %237 = arith.addf %234, %236 : vector<8x128xf32>
    %c0_46 = arith.constant 0 : index
    %c0_47 = arith.constant 0 : index
    %238 = vector.load %arg6[%c0_46, %c0_47] : memref<8x128xf32, #tpu.memory_space<vmem>>, vector<8x128xf32>
    tpu.vector_store %arg6[%c0_46, %c0_47], %237 {strides = array<i32>} : memref<8x128xf32, #tpu.memory_space<vmem>>, vector<8x128xf32>,
    return
  }
}

</mosaic_0001>

<bundles_post_ra>
// kernel: _forward_packed.1
= control target key start
LH: loop header
LB: loop body
LE: loop exit
PB: predicated region body
PF: predicated region fallthrough
CT: control target
= control target key end

     0   :  { %11 = vsyncpa [#allocation3], 0  ;;  %s2161_s21 = smov [#allocation2]   ;;  %s3288_s0 = inlined_call_operand.vmem [shape: f32[64,16], index: 0, kind: input, shape index: {}]   ;;  %s3289_s1 = inlined_call_operand.vmem [shape: f32[16,512], index: 1, kind: input, shape index: {}]   ;;  %s3290_s2 = inlined_call_operand.hbm [shape: f32[128,512], index: 2, kind: input, shape index: {}]   ;;  %s3291_s3 = inlined_call_operand.vmem [shape: f32[1,512], index: 3, kind: input, shape index: {}]   ;;  %s3292_s4 = inlined_call_operand.vmem [shape: f32[128,128], index: 4, kind: input, shape index: {}]   ;;  %s3293_s5 = inlined_call_operand.vmem [shape: f32[1,128], index: 5, kind: input, shape index: {}]   ;;  %s3294_s6 = inlined_call_operand.vmem [shape: f32[8,128], index: 6, kind: output, shape index: {}]  }
   0x1   :  { %s21_s22 = sshll.u32 %s2161_s21, 4  ;;  %s22_s22 = int_to_ptr.vmem [resolvable:$true] %s21_s22 }
   0x2   :  { %s2147_s23 = scalar_lea.vmem %s22_s22, 8192  ;;  %p2152_p1 = scmp.lt.s32.totalorder %s22_s22, %s22_s22 }
   0x3   :  { %p2148_p0 = scmp.ne.s32.totalorder %s22_s22, %s2147_s23  ;;  %p2153_p2 = scmp.lt.s32.totalorder %s2147_s23, %s2147_s23 }
   0x5   :  { %p2154_p3 = por %p2153_p2, %p2152_p1 }
   0x7   :  { %p2155_p4 = pnand %p2154_p3, %p2148_p0 }
   0x9   :  { %2158 = shalt.err (!%p2155_p4)
}
   0xa   :  { %s2162_s24 = smov 512   ;;  %s2163_s25 = smov 32  }
   0xb   :  { %27 = dma.hbm_to_vmem [thread:$0]  %s3290_s2, 8192, %s22_s22, [#allocation3], %s2162_s24, %s2162_s24, %s2163_s25  }
   0xc   :  { %2159 = dma.done.wait [#allocation3], 8192  }
   0xd   :  { %2160 = vsyncadd [#allocation3], 4294959104  ;;  %v3295_v0 = vmov 0.0   ;;  %v50_v1 = vld [vmem:[%s3289_s1 + $0x28] sm:$0xff]  ;;  %v52_v2 = vld [vmem:[%s3289_s1 + $0x38] sm:$0xff]  ;;  %vm75_vm0 = vcmask 130048  }
   0xe   :  { %164 = vmatprep.mubr.f32.mxu0 %v3295_v0  ;;  %277 = vmatprep.mubr.f32.mxu1 %v3295_v0  ;;  %v49_v3 = vld [vmem:[%s3289_s1 + $0x20] sm:$0xff]  ;;  %v51_v4 = vld [vmem:[%s3289_s1 + $0x30] sm:$0xff]  ;;  %v46_v5 = vld [vmem:[%s3289_s1 + $0x8] sm:$0xff]  ;;  %vm2165_vm1 = vmmov 0  }
   0xf   :  { %128 = vmatprep.subr.mxu0 %v50_v1  ;;  %241 = vmatprep.subr.mxu1 %v52_v2  ;;  %v48_v6 = vld [vmem:[%s3289_s1 + $0x18] sm:$0xff]  ;;  %v45_v7 = vld [vmem:[%s3289_s1] sm:$0xff]  ;;  %v47_v8 = vld [vmem:[%s3289_s1 + $0x10] sm:$0xff] }
  0x10   :  { %129 = vmatpush1.msra.mxu0 %v49_v3  ;;  %242 = vmatpush1.msra.mxu1 %v51_v4  ;;  %v37_v9 = vld [vmem:[%s3288_s0] sm:$0xff]  ;;  %v2233_v10 = vld [vmem:[#allocation2 + $0x1e8] sm:$0xff]  ;;  %v2235_v11 = vld [vmem:[#allocation2 + $0x1f8] sm:$0xff] }
  0x11   :  { %130 = vmatprep.subr.mxu0 %v46_v5  ;;  %243 = vmatprep.subr.mxu1 %v48_v6  ;;  %3383 = vst [vmem:[#allocation5_spill] sm:$0xff] %v2233_v10  ;;  %3384 = vst [vmem:[#allocation6_spill] sm:$0xff] %v2235_v11  ;;  %v2237_v12 = vld [vmem:[#allocation2 + $0x1e0] sm:$0xff]  ;;  %v2239_v13 = vld [vmem:[#allocation2 + $0x1f0] sm:$0xff] }
  0x12   :  { %131 = vmatpush1.msra.mxu0 %v45_v7  ;;  %244 = vmatpush1.msra.mxu1 %v47_v8  ;;  %v2243_v14 = vld [vmem:[#allocation2 + $0x1c8] sm:$0xff]  ;;  %v2245_v15 = vld [vmem:[#allocation2 + $0x1d8] sm:$0xff]  ;;  %v2251_v16 = vld [vmem:[#allocation2 + $0x1c0] sm:$0xff] }
  0x13   :  { %1849 = vmatmul.mubr.msk.f32.vlgmr.msra.gmra.mxu0 %vm75_vm0, %v37_v9  ;;  %1857 = vmatmul.mubr.msk.f32.vlgmr.msra.gmra.mxu1 %vm75_vm0, %v37_v9  ;;  %v2253_v17 = vld [vmem:[#allocation2 + $0x1d0] sm:$0xff]  ;;  %v38_v18 = vld [vmem:[%s3288_s0 + $0x8] sm:$0xff]  ;;  %v2264_v20 = vld [vmem:[#allocation2 + $0x1b8] sm:$0xff] }
  0x14   :  { %390 = vmatprep.subr.mxu0 %v2233_v10  ;;  %461 = vmatprep.subr.mxu1 %v2235_v11  ;;  %v2262_v19 = vld [vmem:[#allocation2 + $0x1a8] sm:$0xff]  ;;  %v2268_v21 = vld [vmem:[#allocation2 + $0x1a0] sm:$0xff]  ;;  %v2270_v22 = vld [vmem:[#allocation2 + $0x1b0] sm:$0xff] }
  0x15   :  { %391 = vmatpush1.msra.mxu0 %v2237_v12  ;;  %462 = vmatpush1.msra.mxu1 %v2239_v13  ;;  %v2274_v23 = vld [vmem:[#allocation2 + $0x188] sm:$0xff]  ;;  %v2276_v24 = vld [vmem:[#allocation2 + $0x198] sm:$0xff]  ;;  %v2282_v25 = vld [vmem:[#allocation2 + $0x180] sm:$0xff] }
  0x16   :  { %392 = vmatprep.subr.mxu0 %v2243_v14  ;;  %463 = vmatprep.subr.mxu1 %v2245_v15  ;;  %v2284_v26 = vld [vmem:[#allocation2 + $0x190] sm:$0xff]  ;;  %v2293_v28 = vld [vmem:[#allocation2 + $0x168] sm:$0xff]  ;;  %v2295_v29 = vld [vmem:[#allocation2 + $0x178] sm:$0xff] }
  0x17   :  { %170 = vmatprep.mubr.f32.mxu0 %v3295_v0  ;;  %283 = vmatprep.mubr.f32.mxu1 %v3295_v0  ;;  %v39_v27 = vld [vmem:[%s3288_s0 + $0x10] sm:$0xff]  ;;  %v2299_v30 = vld [vmem:[#allocation2 + $0x160] sm:$0xff]  ;;  %v2305_v32 = vld [vmem:[#allocation2 + $0x148] sm:$0xff] }
  0x18   :  { %393 = vmatpush1.msra.mxu0 %v2251_v16  ;;  %464 = vmatpush1.msra.mxu1 %v2253_v17  ;;  %v2301_v31 = vld [vmem:[#allocation2 + $0x170] sm:$0xff]  ;;  %v2307_v33 = vld [vmem:[#allocation2 + $0x158] sm:$0xff]  ;;  %v2313_v34 = vld [vmem:[#allocation2 + $0x140] sm:$0xff] }
  0x19   :  { %1850 = vmatmul.mubr.msk.f32.gmra.mxu0 %vm75_vm0, %v38_v18  ;;  %1858 = vmatmul.mubr.msk.f32.gmra.mxu1 %vm75_vm0, %v38_v18  ;;  %v2315_v35 = vld [vmem:[#allocation2 + $0x150] sm:$0xff]  ;;  %v40_v36 = vld [vmem:[%s3288_s0 + $0x18] sm:$0xff]  ;;  %v2324_v37 = vld [vmem:[#allocation2 + $0x128] sm:$0xff] }
  0x1a   :  { %394 = vmatprep.subr.mxu0 %v2262_v19  ;;  %465 = vmatprep.subr.mxu1 %v2264_v20  ;;  %v2326_v38 = vld [vmem:[#allocation2 + $0x138] sm:$0xff]  ;;  %v2330_v39 = vld [vmem:[#allocation2 + $0x120] sm:$0xff]  ;;  %v2332_v40 = vld [vmem:[#allocation2 + $0x130] sm:$0xff] }
  0x1b   :  { %395 = vmatpush1.msra.mxu0 %v2268_v21  ;;  %466 = vmatpush1.msra.mxu1 %v2270_v22  ;;  %v2336_v41 = vld [vmem:[#allocation2 + $0x108] sm:$0xff]  ;;  %v2338_v42 = vld [vmem:[#allocation2 + $0x118] sm:$0xff]  ;;  %v2344_v43 = vld [vmem:[#allocation2 + $0x100] sm:$0xff] }
  0x1c   :  { %396 = vmatprep.subr.mxu0 %v2274_v23  ;;  %467 = vmatprep.subr.mxu1 %v2276_v24  ;;  %v2346_v44 = vld [vmem:[#allocation2 + $0x110] sm:$0xff]  ;;  %v41_v45 = vld [vmem:[%s3288_s0 + $0x20] sm:$0xff]  ;;  %v2355_v46 = vld [vmem:[#allocation2 + $0xe8] sm:$0xff] }
  0x1d   :  { %176 = vmatprep.mubr.f32.mxu0 %v3295_v0  ;;  %289 = vmatprep.mubr.f32.mxu1 %v3295_v0  ;;  %v2357_v47 = vld [vmem:[#allocation2 + $0xf8] sm:$0xff]  ;;  %v2361_v48 = vld [vmem:[#allocation2 + $0xe0] sm:$0xff]  ;;  %v2363_v49 = vld [vmem:[#allocation2 + $0xf0] sm:$0xff] }
  0x1e   :  { %397 = vmatpush1.msra.mxu0 %v2282_v25  ;;  %468 = vmatpush1.msra.mxu1 %v2284_v26  ;;  %v2367_v50 = vld [vmem:[#allocation2 + $0xc8] sm:$0xff]  ;;  %v2369_v51 = vld [vmem:[#allocation2 + $0xd8] sm:$0xff]  ;;  %v2375_v52 = vld [vmem:[#allocation2 + $0xc0] sm:$0xff] }
  0x1f   :  { %1851 = vmatmul.mubr.msk.f32.gmra.mxu0 %vm75_vm0, %v39_v27  ;;  %1859 = vmatmul.mubr.msk.f32.gmra.mxu1 %vm75_vm0, %v39_v27  ;;  %v2377_v53 = vld [vmem:[#allocation2 + $0xd0] sm:$0xff]  ;;  %v42_v54 = vld [vmem:[%s3288_s0 + $0x28] sm:$0xff]  ;;  %v2388_v56 = vld [vmem:[#allocation2 + $0xb8] sm:$0xff] }
  0x20   :  { %398 = vmatprep.subr.mxu0 %v2293_v28  ;;  %469 = vmatprep.subr.mxu1 %v2295_v29  ;;  %v2386_v55 = vld [vmem:[#allocation2 + $0xa8] sm:$0xff]  ;;  %v2392_v57 = vld [vmem:[#allocation2 + $0xa0] sm:$0xff]  ;;  %v2394_v58 = vld [vmem:[#allocation2 + $0xb0] sm:$0xff] }
  0x21   :  { %399 = vmatpush1.msra.mxu0 %v2299_v30  ;;  %470 = vmatpush1.msra.mxu1 %v2301_v31  ;;  %v2398_v59 = vld [vmem:[#allocation2 + $0x88] sm:$0xff]  ;;  %v2400_v60 = vld [vmem:[#allocation2 + $0x98] sm:$0xff]  ;;  %v2406_v61 = vld [vmem:[#allocation2 + $0x80] sm:$0xff] }
  0x22   :  { %400 = vmatprep.subr.mxu0 %v2305_v32  ;;  %471 = vmatprep.subr.mxu1 %v2307_v33  ;;  %3385 = vst [vmem:[#allocation7_spill] sm:$0xff] %v2398_v59  ;;  %3386 = vst [vmem:[#allocation8_spill] sm:$0xff] %v2400_v60  ;;  %v2408_v62 = vld [vmem:[#allocation2 + $0x90] sm:$0xff]  ;;  %v2417_v1 = vld [vmem:[#allocation2 + $0x68] sm:$0xff] }
  0x23   :  { %182 = vmatprep.mubr.f32.mxu0 %v3295_v0  ;;  %295 = vmatprep.mubr.f32.mxu1 %v3295_v0  ;;  %3387 = vst [vmem:[#allocation9_spill] sm:$0xff] %v2406_v61  ;;  %3388 = vst [vmem:[#allocation10_spill] sm:$0xff] %v2408_v62  ;;  %v43_v63 = vld [vmem:[%s3288_s0 + $0x30] sm:$0xff]  ;;  %v2419_v2 = vld [vmem:[#allocation2 + $0x78] sm:$0xff] }
  0x24   :  { %401 = vmatpush1.msra.mxu0 %v2313_v34  ;;  %472 = vmatpush1.msra.mxu1 %v2315_v35  ;;  %3389 = vst [vmem:[#allocation11_spill] sm:$0xff] %v2417_v1  ;;  %3390 = vst [vmem:[#allocation12_spill] sm:$0xff] %v2419_v2  ;;  %v2423_v3 = vld [vmem:[#allocation2 + $0x60] sm:$0xff]  ;;  %v2425_v4 = vld [vmem:[#allocation2 + $0x70] sm:$0xff] }
  0x25   :  { %1852 = vmatmul.mubr.msk.f32.gmra.mxu0 %vm75_vm0, %v40_v36  ;;  %1860 = vmatmul.mubr.msk.f32.gmra.mxu1 %vm75_vm0, %v40_v36  ;;  %3391 = vst [vmem:[#allocation13_spill] sm:$0xff] %v2423_v3  ;;  %3392 = vst [vmem:[#allocation14_spill] sm:$0xff] %v2425_v4  ;;  %v2429_v5 = vld [vmem:[#allocation2 + $0x48] sm:$0xff]  ;;  %v2431_v6 = vld [vmem:[#allocation2 + $0x58] sm:$0xff] }
  0x26   :  { %402 = vmatprep.subr.mxu0 %v2324_v37  ;;  %473 = vmatprep.subr.mxu1 %v2326_v38  ;;  %3393 = vst [vmem:[#allocation15_spill] sm:$0xff] %v2429_v5  ;;  %3394 = vst [vmem:[#allocation16_spill] sm:$0xff] %v2431_v6  ;;  %v2437_v7 = vld [vmem:[#allocation2 + $0x40] sm:$0xff]  ;;  %v2439_v8 = vld [vmem:[#allocation2 + $0x50] sm:$0xff] }
  0x27   :  { %403 = vmatpush1.msra.mxu0 %v2330_v39  ;;  %474 = vmatpush1.msra.mxu1 %v2332_v40  ;;  %3395 = vst [vmem:[#allocation17_spill] sm:$0xff] %v2437_v7  ;;  %3396 = vst [vmem:[#allocation18_spill] sm:$0xff] %v2439_v8  ;;  %v44_v9 = vld [vmem:[%s3288_s0 + $0x38] sm:$0xff]  ;;  %v2448_v18 = vld [vmem:[#allocation2 + $0x28] sm:$0xff] }
  0x28   :  { %404 = vmatprep.subr.mxu0 %v2336_v41  ;;  %475 = vmatprep.subr.mxu1 %v2338_v42  ;;  %3397 = vst [vmem:[#allocation19_spill] sm:$0xff] %v2448_v18  ;;  %v2450_v27 = vld [vmem:[#allocation2 + $0x38] sm:$0xff]  ;;  %v2454_v36 = vld [vmem:[#allocation2 + $0x20] sm:$0xff] }
  0x29   :  { %188 = vmatprep.mubr.f32.mxu0 %v3295_v0  ;;  %301 = vmatprep.mubr.f32.mxu1 %v3295_v0  ;;  %3398 = vst [vmem:[#allocation20_spill] sm:$0xff] %v2450_v27  ;;  %3399 = vst [vmem:[#allocation21_spill] sm:$0xff] %v2454_v36 }
  0x2a   :  { %405 = vmatpush1.msra.mxu0 %v2344_v43  ;;  %476 = vmatpush1.msra.mxu1 %v2346_v44 }
  0x2b   :  { %1853 = vmatmul.mubr.msk.f32.gmra.mxu0 %vm75_vm0, %v41_v45  ;;  %1861 = vmatmul.mubr.msk.f32.gmra.mxu1 %vm75_vm0, %v41_v45  ;;  %v2456_v45 = vld [vmem:[#allocation2 + $0x30] sm:$0xff] }
  0x2c   :  { %406 = vmatprep.subr.mxu0 %v2355_v46  ;;  %477 = vmatprep.subr.mxu1 %v2357_v47  ;;  %3400 = vst [vmem:[#allocation22_spill] sm:$0xff] %v2456_v45 }
  0x2d   :  { %407 = vmatpush1.msra.mxu0 %v2361_v48  ;;  %478 = vmatpush1.msra.mxu1 %v2363_v49 }
  0x2e   :  { %408 = vmatprep.subr.mxu0 %v2367_v50  ;;  %479 = vmatprep.subr.mxu1 %v2369_v51 }
  0x2f   :  { %194 = vmatprep.mubr.f32.mxu0 %v3295_v0  ;;  %307 = vmatprep.mubr.f32.mxu1 %v3295_v0 }
  0x30   :  { %409 = vmatpush1.msra.mxu0 %v2375_v52  ;;  %480 = vmatpush1.msra.mxu1 %v2377_v53 }
  0x31   :  { %1854 = vmatmul.mubr.msk.f32.gmra.mxu0 %vm75_vm0, %v42_v54  ;;  %1862 = vmatmul.mubr.msk.f32.gmra.mxu1 %vm75_vm0, %v42_v54  ;;  %v2460_v54 = vld [vmem:[#allocation2 + $0x8] sm:$0xff] }
  0x32   :  { %410 = vmatprep.subr.mxu0 %v2386_v55  ;;  %481 = vmatprep.subr.mxu1 %v2388_v56  ;;  %3401 = vst [vmem:[#allocation23_spill] sm:$0xff] %v2460_v54 }
  0x33   :  { %411 = vmatpush1.msra.mxu0 %v2392_v57  ;;  %482 = vmatpush1.msra.mxu1 %v2394_v58 }
  0x34   :  { %412 = vmatprep.subr.mxu0 %v2398_v59  ;;  %483 = vmatprep.subr.mxu1 %v2400_v60 }
  0x35   :  { %200 = vmatprep.mubr.f32.mxu0 %v3295_v0  ;;  %313 = vmatprep.mubr.f32.mxu1 %v3295_v0 }
  0x36   :  { %413 = vmatpush1.msra.mxu0 %v2406_v61  ;;  %484 = vmatpush1.msra.mxu1 %v2408_v62 }
  0x37   :  { %1855 = vmatmul.mubr.msk.f32.gmra.mxu0 %vm75_vm0, %v43_v63  ;;  %1863 = vmatmul.mubr.msk.f32.gmra.mxu1 %vm75_vm0, %v43_v63  ;;  %v2462_v63 = vld [vmem:[#allocation2 + $0x18] sm:$0xff] }
  0x38   :  { %414 = vmatprep.subr.mxu0 %v2417_v1  ;;  %485 = vmatprep.subr.mxu1 %v2419_v2  ;;  %3402 = vst [vmem:[#allocation24_spill] sm:$0xff] %v2462_v63 }
  0x39   :  { %415 = vmatpush1.msra.mxu0 %v2423_v3  ;;  %486 = vmatpush1.msra.mxu1 %v2425_v4 }
  0x3a   :  { %416 = vmatprep.subr.mxu0 %v2429_v5  ;;  %487 = vmatprep.subr.mxu1 %v2431_v6 }
  0x3b   :  { %206 = vmatprep.mubr.f32.mxu0 %v3295_v0  ;;  %319 = vmatprep.mubr.f32.mxu1 %v3295_v0  ;;  %v2466_v0 = vld [vmem:[#allocation2] sm:$0xff] }
  0x3c   :  { %417 = vmatpush1.msra.mxu0 %v2437_v7  ;;  %488 = vmatpush1.msra.mxu1 %v2439_v8  ;;  %3403 = vst [vmem:[#allocation25_spill] sm:$0xff] %v2466_v0  ;;  %v2470_v8 = vld [vmem:[#allocation2 + $0x10] sm:$0xff] }
  0x3d   :  { %1856 = vmatmul.mubr.msk.f32.gmra.mxu0 %vm75_vm0, %v44_v9  ;;  %1864 = vmatmul.mubr.msk.f32.gmra.mxu1 %vm75_vm0, %v44_v9  ;;  %3404 = vst [vmem:[#allocation26_spill] sm:$0xff] %v2470_v8  ;;  %v3405_v9 = vmov 0.0  }
  0x3e   :  { %418 = vmatprep.subr.mxu0 %v2448_v18  ;;  %489 = vmatprep.subr.mxu1 %v2450_v27 }
  0x3f   :  { %419 = vmatpush1.msra.mxu0 %v2454_v36  ;;  %490 = vmatpush1.msra.mxu1 %v2456_v45 }
  0x40   :  { %420 = vmatprep.subr.mxu0 %v2460_v54  ;;  %491 = vmatprep.subr.mxu1 %v2462_v63 }
  0x41   :  { %421 = vmatpush1.msra.mxu0 %v2466_v0  ;;  %454 = vmatprep.mubr.f32.mxu0 %v3405_v9 }
  0x42   :  { %492 = vmatpush1.msra.mxu1 %v2470_v8  ;;  %525 = vmatprep.mubr.f32.mxu1 %v3405_v9 }
  0x43   :  { %455 = vmatmul.mubr.f32.vlgmr.msra.gmra.mxu0 %v3405_v9  ;;  %526 = vmatmul.mubr.f32.vlgmr.msra.gmra.mxu1 %v3405_v9 }
  0x44   :  { %560 = vmatprep.subr.mxu0 %v2233_v10  ;;  %631 = vmatprep.subr.mxu1 %v2235_v11 }
  0x45   :  { %561 = vmatpush1.msra.mxu0 %v2237_v12  ;;  %632 = vmatpush1.msra.mxu1 %v2239_v13 }
  0x46   :  { %562 = vmatprep.subr.mxu0 %v2243_v14  ;;  %633 = vmatprep.subr.mxu1 %v2245_v15 }
  0x47   :  { %563 = vmatpush1.msra.mxu0 %v2251_v16  ;;  %634 = vmatpush1.msra.mxu1 %v2253_v17 }
  0x48   :  { %564 = vmatprep.subr.mxu0 %v2262_v19  ;;  %635 = vmatprep.subr.mxu1 %v2264_v20 }
  0x49   :  { %565 = vmatpush1.msra.mxu0 %v2268_v21  ;;  %636 = vmatpush1.msra.mxu1 %v2270_v22 }
  0x4a   :  { %566 = vmatprep.subr.mxu0 %v2274_v23  ;;  %637 = vmatprep.subr.mxu1 %v2276_v24 }
  0x4b   :  { %567 = vmatpush1.msra.mxu0 %v2282_v25  ;;  %638 = vmatpush1.msra.mxu1 %v2284_v26 }
  0x4c   :  { %568 = vmatprep.subr.mxu0 %v2293_v28  ;;  %639 = vmatprep.subr.mxu1 %v2295_v29 }
  0x4d   :  { %569 = vmatpush1.msra.mxu0 %v2299_v30  ;;  %640 = vmatpush1.msra.mxu1 %v2301_v31 }
  0x4e   :  { %570 = vmatprep.subr.mxu0 %v2305_v32  ;;  %641 = vmatprep.subr.mxu1 %v2307_v33 }
  0x4f   :  { %571 = vmatpush1.msra.mxu0 %v2313_v34  ;;  %642 = vmatpush1.msra.mxu1 %v2315_v35 }
  0x50   :  { %572 = vmatprep.subr.mxu0 %v2324_v37  ;;  %643 = vmatprep.subr.mxu1 %v2326_v38 }
  0x51   :  { %573 = vmatpush1.msra.mxu0 %v2330_v39  ;;  %644 = vmatpush1.msra.mxu1 %v2332_v40 }
  0x52   :  { %574 = vmatprep.subr.mxu0 %v2336_v41  ;;  %645 = vmatprep.subr.mxu1 %v2338_v42 }
  0x53   :  { %575 = vmatpush1.msra.mxu0 %v2344_v43  ;;  %646 = vmatpush1.msra.mxu1 %v2346_v44 }
  0x54   :  { %576 = vmatprep.subr.mxu0 %v2355_v46  ;;  %647 = vmatprep.subr.mxu1 %v2357_v47 }
  0x55   :  { %577 = vmatpush1.msra.mxu0 %v2361_v48  ;;  %648 = vmatpush1.msra.mxu1 %v2363_v49 }
  0x56   :  { %578 = vmatprep.subr.mxu0 %v2367_v50  ;;  %649 = vmatprep.subr.mxu1 %v2369_v51 }
  0x57   :  { %579 = vmatpush1.msra.mxu0 %v2375_v52  ;;  %650 = vmatpush1.msra.mxu1 %v2377_v53 }
  0x58   :  { %580 = vmatprep.subr.mxu0 %v2386_v55  ;;  %651 = vmatprep.subr.mxu1 %v2388_v56 }
  0x59   :  { %581 = vmatpush1.msra.mxu0 %v2392_v57  ;;  %652 = vmatpush1.msra.mxu1 %v2394_v58 }
  0x5a   :  { %582 = vmatprep.subr.mxu0 %v2398_v59  ;;  %653 = vmatprep.subr.mxu1 %v2400_v60  ;;  %v3406_v59 = vld [vmem:[#allocation18_spill] sm:$0xff] }
  0x5b   :  { %583 = vmatpush1.msra.mxu0 %v2406_v61  ;;  %654 = vmatpush1.msra.mxu1 %v2408_v62 }
  0x5c   :  { %584 = vmatprep.subr.mxu0 %v2417_v1  ;;  %655 = vmatprep.subr.mxu1 %v2419_v2 }
  0x5d   :  { %585 = vmatpush1.msra.mxu0 %v2423_v3  ;;  %656 = vmatpush1.msra.mxu1 %v2425_v4 }
  0x5e   :  { %586 = vmatprep.subr.mxu0 %v2429_v5  ;;  %657 = vmatprep.subr.mxu1 %v2431_v6 }
  0x5f   :  { %587 = vmatpush1.msra.mxu0 %v2437_v7  ;;  %658 = vmatpush1.msra.mxu1 %v3406_v59 }
  0x60   :  { %588 = vmatprep.subr.mxu0 %v2448_v18  ;;  %659 = vmatprep.subr.mxu1 %v2450_v27  ;;  %v55_v27 = vlaneseq }
  0x61   :  { %589 = vmatpush1.msra.mxu0 %v2454_v36  ;;  %660 = vmatpush1.msra.mxu1 %v2456_v45 }
  0x62   :  { %590 = vmatprep.subr.mxu0 %v2460_v54  ;;  %661 = vmatprep.subr.mxu1 %v2462_v63  ;;  %v56_v36 = vshrl.u32 %v55_v27, 7 }
  0x63   :  { %591 = vmatpush1.msra.mxu0 %v2466_v0  ;;  %624 = vmatprep.mubr.f32.mxu0 %v3405_v9  ;;  %v53_v0 = vld [vmem:[%s3291_s3] sm:$0xf] }
  0x64   :  { %662 = vmatpush1.msra.mxu1 %v2470_v8  ;;  %695 = vmatprep.mubr.f32.mxu1 %v3405_v9  ;;  %v57_v54 = vsub.s32 0, %v56_v36  ;;  %v65_v63 = vsub.s32 2, %v56_v36  ;;  %v61_v9 = vsub.s32 1, %v56_v36 }
  0x65   :  { %730 = vmatprep.subr.mxu0 %v2233_v10  ;;  %801 = vmatprep.subr.mxu1 %v2235_v11  ;;  %v69_v10 = vsub.s32 3, %v56_v36 }
  0x66   :  { %v58_v7 = vrot.slane %v53_v0, %v57_v54  ;;  %v2559_v11 = vrot.slane %v53_v0, %v65_v63  ;;  %v62_v5 = vrot.slane %v53_v0, %v61_v9 }
  0x67   :  { %v2561_v4 = vrot.slane %v53_v0, %v69_v10 }
  0xd3   :  { %v2548_v18 = vpop.f32.mrf.mxu0  ;;  %v2550_v45 = vpop.f32.mrf.mxu1 }
  0xd5   :  { %v2555_v59 = vpop.f32.mrf.mxu0  ;;  %v2557_v8 = vpop.f32.mrf.mxu1 }
  0xd9   :  { %v172_v27 = vpop.f32.mrf.mxu0  ;;  %v285_v6 = vpop.f32.mrf.mxu1 }
  0xda   :  { %v2563_v3 = vadd.f32 %v172_v27, %v58_v7  ;;  %v2566_v2 = vadd.f32 %v285_v6, %v2559_v11 }
  0xdb   :  { %v174_v1 = vpop.f32.mrf.mxu0  ;;  %v287_v62 = vpop.f32.mrf.mxu1 }
  0xdc   :  { %3407 = vst [vmem:[#allocation27_spill] sm:$0xff] %v2563_v3  ;;  %3408 = vst [vmem:[#allocation28_spill] sm:$0xff] %v2566_v2  ;;  %v2568_v61 = vadd.f32 %v174_v1, %v62_v5  ;;  %v2571_v60 = vadd.f32 %v287_v62, %v2561_v4 }
  0xde   :  { %3409 = vst [vmem:[#allocation29_spill] sm:$0xff] %v2568_v61  ;;  %3410 = vst [vmem:[#allocation30_spill] sm:$0xff] %v2571_v60 }
  0xdf   :  { %v178_v36 = vpop.f32.mrf.mxu0  ;;  %v291_v54 = vpop.f32.mrf.mxu1 }
  0xe0   :  { %v2573_v63 = vadd.f32 %v178_v36, %v58_v7  ;;  %v2576_v9 = vadd.f32 %v291_v54, %v2559_v11 }
  0xe1   :  { %v180_v0 = vpop.f32.mrf.mxu0  ;;  %v293_v10 = vpop.f32.mrf.mxu1 }
  0xe2   :  { %3411 = vst [vmem:[#allocation31_spill] sm:$0xff] %v2573_v63  ;;  %3412 = vst [vmem:[#allocation32_spill] sm:$0xff] %v2576_v9  ;;  %v2578_v27 = vadd.f32 %v180_v0, %v62_v5  ;;  %v2581_v6 = vadd.f32 %v293_v10, %v2561_v4 }
  0xe4   :  { %3413 = vst [vmem:[#allocation33_spill] sm:$0xff] %v2578_v27  ;;  %3414 = vst [vmem:[#allocation34_spill] sm:$0xff] %v2581_v6 }
  0xe5   :  { %v184_v2 = vpop.f32.mrf.mxu0  ;;  %v297_v1 = vpop.f32.mrf.mxu1 }
  0xe6   :  { %v2583_v61 = vadd.f32 %v184_v2, %v58_v7  ;;  %v2586_v62 = vadd.f32 %v297_v1, %v2559_v11 }
  0xe7   :  { %v186_v60 = vpop.f32.mrf.mxu0  ;;  %v299_v36 = vpop.f32.mrf.mxu1 }
  0xe8   :  { %3415 = vst [vmem:[#allocation35_spill] sm:$0xff] %v2583_v61  ;;  %3416 = vst [vmem:[#allocation36_spill] sm:$0xff] %v2586_v62  ;;  %v2588_v63 = vadd.f32 %v186_v60, %v62_v5  ;;  %v2591_v54 = vadd.f32 %v299_v36, %v2561_v4 }
  0xea   :  { %3417 = vst [vmem:[#allocation37_spill] sm:$0xff] %v2588_v63  ;;  %3418 = vst [vmem:[#allocation38_spill] sm:$0xff] %v2591_v54 }
  0xeb   :  { %v190_v9 = vpop.f32.mrf.mxu0  ;;  %v303_v0 = vpop.f32.mrf.mxu1 }
  0xec   :  { %v2593_v27 = vadd.f32 %v190_v9, %v58_v7  ;;  %v2596_v10 = vadd.f32 %v303_v0, %v2559_v11 }
  0xed   :  { %v192_v6 = vpop.f32.mrf.mxu0  ;;  %v305_v2 = vpop.f32.mrf.mxu1 }
  0xee   :  { %3419 = vst [vmem:[#allocation39_spill] sm:$0xff] %v2593_v27  ;;  %3420 = vst [vmem:[#allocation40_spill] sm:$0xff] %v2596_v10  ;;  %v2598_v61 = vadd.f32 %v192_v6, %v62_v5  ;;  %v2601_v1 = vadd.f32 %v305_v2, %v2561_v4 }
  0xf0   :  { %3421 = vst [vmem:[#allocation41_spill] sm:$0xff] %v2598_v61  ;;  %3422 = vst [vmem:[#allocation42_spill] sm:$0xff] %v2601_v1 }
  0xf1   :  { %v196_v62 = vpop.f32.mrf.mxu0  ;;  %v309_v60 = vpop.f32.mrf.mxu1 }
  0xf2   :  { %v2603_v63 = vadd.f32 %v196_v62, %v58_v7  ;;  %v2606_v36 = vadd.f32 %v309_v60, %v2559_v11 }
  0xf3   :  { %v198_v54 = vpop.f32.mrf.mxu0  ;;  %v311_v9 = vpop.f32.mrf.mxu1 }
  0xf4   :  { %3423 = vst [vmem:[#allocation43_spill] sm:$0xff] %v2603_v63  ;;  %3424 = vst [vmem:[#allocation44_spill] sm:$0xff] %v2606_v36  ;;  %v2608_v27 = vadd.f32 %v198_v54, %v62_v5  ;;  %v2611_v0 = vadd.f32 %v311_v9, %v2561_v4 }
  0xf6   :  { %3425 = vst [vmem:[#allocation45_spill] sm:$0xff] %v2608_v27  ;;  %3426 = vst [vmem:[#allocation46_spill] sm:$0xff] %v2611_v0 }
  0xf7   :  { %v202_v10 = vpop.f32.mrf.mxu0  ;;  %v315_v6 = vpop.f32.mrf.mxu1 }
  0xf8   :  { %v2613_v61 = vadd.f32 %v202_v10, %v58_v7  ;;  %v2616_v2 = vadd.f32 %v315_v6, %v2559_v11 }
  0xf9   :  { %v204_v1 = vpop.f32.mrf.mxu0  ;;  %v317_v62 = vpop.f32.mrf.mxu1 }
  0xfa   :  { %3427 = vst [vmem:[#allocation47_spill] sm:$0xff] %v2613_v61  ;;  %3428 = vst [vmem:[#allocation48_spill] sm:$0xff] %v2616_v2  ;;  %v2618_v63 = vadd.f32 %v204_v1, %v62_v5  ;;  %v2621_v60 = vadd.f32 %v317_v62, %v2561_v4  ;;  %v167_v1 = vadd.f32 %v2548_v18, %v58_v7 }
  0xfb   :  { %v169_v62 = vadd.f32 %v2555_v59, %v62_v5 }
  0xfc   :  { %3429 = vst [vmem:[#allocation49_spill] sm:$0xff] %v2618_v63  ;;  %3430 = vst [vmem:[#allocation50_spill] sm:$0xff] %v2621_v60 }
  0xfd   :  { %v208_v36 = vpop.f32.mrf.mxu0  ;;  %v321_v54 = vpop.f32.mrf.mxu1 }
  0xfe   :  { %v2623_v27 = vadd.f32 %v208_v36, %v58_v7  ;;  %v2626_v9 = vadd.f32 %v321_v54, %v2559_v11 }
  0xff   :  { %v210_v0 = vpop.f32.mrf.mxu0  ;;  %v323_v10 = vpop.f32.mrf.mxu1 }
 0x100   :  { %3431 = vst [vmem:[#allocation51_spill] sm:$0xff] %v2623_v27  ;;  %3432 = vst [vmem:[#allocation52_spill] sm:$0xff] %v2626_v9  ;;  %v2628_v61 = vadd.f32 %v210_v0, %v62_v5  ;;  %v2631_v6 = vadd.f32 %v323_v10, %v2561_v4  ;;  %v282_v0 = vadd.f32 %v2557_v8, %v2561_v4 }
 0x101   :  { %v280_v10 = vadd.f32 %v2550_v45, %v2559_v11 }
 0x102   :  { %3433 = vst [vmem:[#allocation53_spill] sm:$0xff] %v2628_v61  ;;  %3434 = vst [vmem:[#allocation54_spill] sm:$0xff] %v2631_v6 }
 0x103   :  { %v456_v2 = vpop.f32.mrf.mxu0  ;;  %v527_v27 = vpop.f32.mrf.mxu1 }
 0x104   :  { %v532_v60 = vadd.f32 %v456_v2, %v167_v1  ;;  %v534_v6 = vadd.f32 %v527_v27, %v280_v10  ;;  %v3435_v27 = vld [vmem:[#allocation7_spill] sm:$0xff]  ;;  %v3440_v10 = vld [vmem:[#allocation12_spill] sm:$0xff] }
 0x105   :  { %v458_v63 = vpop.f32.mrf.mxu0  ;;  %v529_v9 = vpop.f32.mrf.mxu1 }
 0x106   :  { %v1865_v3 = vmul.f32 -1.442695, %v532_v60  ;;  %v533_v36 = vadd.f32 %v458_v63, %v169_v62  ;;  %v535_v61 = vadd.f32 %v529_v9, %v282_v0  ;;  %v3439_v0 = vld [vmem:[#allocation11_spill] sm:$0xff] }
 0x108   :  { %1947 = vpow2.f32 %v1865_v3  ;;  %v1866_v54 = vmul.f32 -1.442695, %v533_v36  ;;  %v1867_v7 = vmul.f32 -1.442695, %v535_v61  ;;  %v3437_v36 = vld [vmem:[#allocation9_spill] sm:$0xff] }
 0x10a   :  { %1949 = vpow2.f32 %v1866_v54  ;;  %v3438_v54 = vld [vmem:[#allocation10_spill] sm:$0xff] }
 0x10b   :  { %1951 = vpow2.f32 %v1867_v7  ;;  %v3441_v7 = vld [vmem:[#allocation13_spill] sm:$0xff] }
 0x115   :  { %v1948_v18 = vpop.eup %1947 }
 0x116   :  { %v539_v59 = vadd.f32 1.0, %v1948_v18  ;;  %v3442_v18 = vld [vmem:[#allocation14_spill] sm:$0xff] }
 0x117   :  { %v1950_v5 = vpop.eup %1949 }
 0x118   :  { %1953 = vrcp.f32 %v539_v59  ;;  %v545_v63 = vadd.f32 1.0, %v1950_v5  ;;  %v1952_v3 = vpop.eup %1951  ;;  %v3443_v59 = vld [vmem:[#allocation15_spill] sm:$0xff]  ;;  %v3444_v5 = vld [vmem:[#allocation16_spill] sm:$0xff] }
 0x119   :  { %1955 = vtanh.f32 %v534_v6  ;;  %v552_v62 = vadd.f32 1.0, %v1952_v3  ;;  %v3436_v6 = vld [vmem:[#allocation8_spill] sm:$0xff]  ;;  %v3446_v3 = vld [vmem:[#allocation18_spill] sm:$0xff] }
 0x11a   :  { %1957 = vrcp.f32 %v545_v63  ;;  %v3445_v63 = vld [vmem:[#allocation17_spill] sm:$0xff] }
 0x11b   :  { %1959 = vrcp.f32 %v552_v62  ;;  %v3450_v62 = vld [vmem:[#allocation22_spill] sm:$0xff] }
 0x125   :  { %v1954_v2 = vpop.eup %1953 }
 0x126   :  { %v1956_v60 = vpop.eup %1955 }
 0x127   :  { %v1958_v1 = vpop.eup %1957  ;;  %v556_v8 = vmul.f32 %v1956_v60, %v1954_v2  ;;  %v3447_v2 = vld [vmem:[#allocation19_spill] sm:$0xff]  ;;  %v3448_v60 = vld [vmem:[#allocation20_spill] sm:$0xff] }
 0x128   :  { %v555_v4 = vmul.f32 0.0, %v1958_v1  ;;  %v1960_v11 = vpop.eup %1959  ;;  %v3449_v1 = vld [vmem:[#allocation21_spill] sm:$0xff] }
 0x12a   :  { %v2639_v9 = vadd.f32 %v556_v8, %v555_v4  ;;  %v3451_v4 = vld [vmem:[#allocation23_spill] sm:$0xff]  ;;  %v3452_v8 = vld [vmem:[#allocation24_spill] sm:$0xff] }
 0x12c   :  { %1961 = vtanh.f32 %v2639_v9 }
 0x139   :  { %v1962_v61 = vpop.eup %1961 }
 0x13a   :  { %v559_v45 = vmul.f32 %v1962_v61, %v1960_v11  ;;  %v3453_v11 = vld [vmem:[#allocation25_spill] sm:$0xff]  ;;  %v3454_v61 = vmov 0.0  }
 0x13c   :  { %625 = vmatmul.mubr.f32.vlgmr.msra.gmra.mxu0 %v559_v45  ;;  %696 = vmatmul.mubr.f32.vlgmr.msra.gmra.mxu1 %v559_v45  ;;  %v3455_v45 = vld [vmem:[#allocation26_spill] sm:$0xff] }
 0x13d   :  { %731 = vmatpush1.msra.mxu0 %v2237_v12  ;;  %802 = vmatpush1.msra.mxu1 %v2239_v13 }
 0x13e   :  { %732 = vmatprep.subr.mxu0 %v2243_v14  ;;  %803 = vmatprep.subr.mxu1 %v2245_v15 }
 0x13f   :  { %733 = vmatpush1.msra.mxu0 %v2251_v16  ;;  %804 = vmatpush1.msra.mxu1 %v2253_v17 }
 0x140   :  { %734 = vmatprep.subr.mxu0 %v2262_v19  ;;  %805 = vmatprep.subr.mxu1 %v2264_v20 }
 0x141   :  { %735 = vmatpush1.msra.mxu0 %v2268_v21  ;;  %806 = vmatpush1.msra.mxu1 %v2270_v22 }
 0x142   :  { %736 = vmatprep.subr.mxu0 %v2274_v23  ;;  %807 = vmatprep.subr.mxu1 %v2276_v24 }
 0x143   :  { %737 = vmatpush1.msra.mxu0 %v2282_v25  ;;  %808 = vmatpush1.msra.mxu1 %v2284_v26 }
 0x144   :  { %738 = vmatprep.subr.mxu0 %v2293_v28  ;;  %809 = vmatprep.subr.mxu1 %v2295_v29 }
 0x145   :  { %739 = vmatpush1.msra.mxu0 %v2299_v30  ;;  %810 = vmatpush1.msra.mxu1 %v2301_v31 }
 0x146   :  { %740 = vmatprep.subr.mxu0 %v2305_v32  ;;  %811 = vmatprep.subr.mxu1 %v2307_v33 }
 0x147   :  { %741 = vmatpush1.msra.mxu0 %v2313_v34  ;;  %812 = vmatpush1.msra.mxu1 %v2315_v35 }
 0x148   :  { %742 = vmatprep.subr.mxu0 %v2324_v37  ;;  %813 = vmatprep.subr.mxu1 %v2326_v38 }
 0x149   :  { %743 = vmatpush1.msra.mxu0 %v2330_v39  ;;  %814 = vmatpush1.msra.mxu1 %v2332_v40 }
 0x14a   :  { %744 = vmatprep.subr.mxu0 %v2336_v41  ;;  %815 = vmatprep.subr.mxu1 %v2338_v42 }
 0x14b   :  { %745 = vmatpush1.msra.mxu0 %v2344_v43  ;;  %816 = vmatpush1.msra.mxu1 %v2346_v44 }
 0x14c   :  { %746 = vmatprep.subr.mxu0 %v2355_v46  ;;  %817 = vmatprep.subr.mxu1 %v2357_v47 }
 0x14d   :  { %747 = vmatpush1.msra.mxu0 %v2361_v48  ;;  %818 = vmatpush1.msra.mxu1 %v2363_v49 }
 0x14e   :  { %748 = vmatprep.subr.mxu0 %v2367_v50  ;;  %819 = vmatprep.subr.mxu1 %v2369_v51 }
 0x14f   :  { %749 = vmatpush1.msra.mxu0 %v2375_v52  ;;  %820 = vmatpush1.msra.mxu1 %v2377_v53 }
 0x150   :  { %750 = vmatprep.subr.mxu0 %v2386_v55  ;;  %821 = vmatprep.subr.mxu1 %v2388_v56 }
 0x151   :  { %751 = vmatpush1.msra.mxu0 %v2392_v57  ;;  %822 = vmatpush1.msra.mxu1 %v2394_v58 }
 0x152   :  { %752 = vmatprep.subr.mxu0 %v3435_v27  ;;  %823 = vmatprep.subr.mxu1 %v3436_v6 }
 0x153   :  { %753 = vmatpush1.msra.mxu0 %v3437_v36  ;;  %824 = vmatpush1.msra.mxu1 %v3438_v54 }
 0x154   :  { %754 = vmatprep.subr.mxu0 %v3439_v0  ;;  %825 = vmatprep.subr.mxu1 %v3440_v10  ;;  %v3461_v10 = vld [vmem:[#allocation28_spill] sm:$0xff] }
 0x155   :  { %755 = vmatpush1.msra.mxu0 %v3441_v7  ;;  %826 = vmatpush1.msra.mxu1 %v3442_v18  ;;  %v3460_v7 = vld [vmem:[#allocation30_spill] sm:$0xff] }
 0x156   :  { %756 = vmatprep.subr.mxu0 %v3443_v59  ;;  %827 = vmatprep.subr.mxu1 %v3444_v5 }
 0x157   :  { %757 = vmatpush1.msra.mxu0 %v3445_v63  ;;  %828 = vmatpush1.msra.mxu1 %v3446_v3  ;;  %v3456_v3 = vld [vmem:[#allocation5_spill] sm:$0xff] }
 0x158   :  { %758 = vmatprep.subr.mxu0 %v3447_v2  ;;  %829 = vmatprep.subr.mxu1 %v3448_v60  ;;  %v3457_v2 = vld [vmem:[#allocation6_spill] sm:$0xff] }
 0x159   :  { %759 = vmatpush1.msra.mxu0 %v3449_v1  ;;  %830 = vmatpush1.msra.mxu1 %v3450_v62  ;;  %v3458_v1 = vld [vmem:[#allocation27_spill] sm:$0xff] }
 0x15a   :  { %760 = vmatprep.subr.mxu0 %v3451_v4  ;;  %831 = vmatprep.subr.mxu1 %v3452_v8  ;;  %v3459_v4 = vld [vmem:[#allocation29_spill] sm:$0xff] }
 0x15b   :  { %761 = vmatpush1.msra.mxu0 %v3453_v11  ;;  %794 = vmatprep.mubr.f32.mxu0 %v3454_v61 }
 0x15c   :  { %832 = vmatpush1.msra.mxu1 %v3455_v45  ;;  %865 = vmatprep.mubr.f32.mxu1 %v3454_v61 }
 0x15d   :  { %900 = vmatprep.subr.mxu0 %v3456_v3  ;;  %971 = vmatprep.subr.mxu1 %v3457_v2 }
 0x1fc   :  { %v626_v60 = vpop.f32.mrf.mxu0  ;;  %v697_v8 = vpop.f32.mrf.mxu1 }
 0x1fd   :  { %v702_v63 = vadd.f32 %v626_v60, %v3458_v1  ;;  %v704_v61 = vadd.f32 %v697_v8, %v3461_v10 }
 0x1fe   :  { %v628_v62 = vpop.f32.mrf.mxu0  ;;  %v699_v18 = vpop.f32.mrf.mxu1 }
 0x1ff   :  { %v1868_v5 = vmul.f32 -1.442695, %v702_v63  ;;  %v703_v59 = vadd.f32 %v628_v62, %v3459_v4  ;;  %v705_v45 = vadd.f32 %v699_v18, %v3460_v7 }
 0x201   :  { %1963 = vpow2.f32 %v1868_v5  ;;  %v1869_v11 = vmul.f32 -1.442695, %v703_v59  ;;  %v1870_v0 = vmul.f32 -1.442695, %v705_v45 }
 0x203   :  { %1965 = vpow2.f32 %v1869_v11 }
 0x204   :  { %1967 = vtanh.f32 %v704_v61 }
 0x205   :  { %1969 = vpow2.f32 %v1870_v0 }
 0x20e   :  { %v1964_v3 = vpop.eup %1963 }
 0x20f   :  { %v709_v54 = vadd.f32 1.0, %v1964_v3 }
 0x210   :  { %v1966_v2 = vpop.eup %1965 }
 0x211   :  { %1971 = vrcp.f32 %v709_v54  ;;  %v715_v60 = vadd.f32 1.0, %v1966_v2  ;;  %v1968_v63 = vpop.eup %1967  ;;  %v3483_v54 = vld [vmem:[#allocation33_spill] sm:$0xff]  ;;  %v3484_v2 = vld [vmem:[#allocation34_spill] sm:$0xff] }
 0x212   :  { %v1970_v1 = vpop.eup %1969 }
 0x213   :  { %1973 = vrcp.f32 %v715_v60  ;;  %v722_v4 = vadd.f32 1.0, %v1970_v1 }
 0x215   :  { %1975 = vrcp.f32 %v722_v4 }
 0x21e   :  { %v1972_v5 = vpop.eup %1971 }
 0x21f   :  { %v726_v62 = vmul.f32 %v1972_v5, %v1968_v63  ;;  %v3485_v63 = vld [vmem:[#allocation32_spill] sm:$0xff] }
 0x220   :  { %v1974_v59 = vpop.eup %1973 }
 0x221   :  { %v725_v11 = vmul.f32 %v1974_v59, %v2639_v9 }
 0x222   :  { %v1976_v10 = vpop.eup %1975 }
 0x223   :  { %v2713_v7 = vadd.f32 %v726_v62, %v725_v11 }
 0x225   :  { %1977 = vtanh.f32 %v2713_v7 }
 0x232   :  { %v1978_v18 = vpop.eup %1977 }
 0x233   :  { %v729_v8 = vmul.f32 %v1978_v18, %v1976_v10 }
 0x235   :  { %795 = vmatmul.mubr.f32.vlgmr.msra.gmra.mxu0 %v729_v8  ;;  %866 = vmatmul.mubr.f32.vlgmr.msra.gmra.mxu1 %v729_v8 }
 0x236   :  { %901 = vmatpush1.msra.mxu0 %v2237_v12  ;;  %972 = vmatpush1.msra.mxu1 %v2239_v13  ;;  %v3462_v12 = vld [vmem:[#allocation10_spill] sm:$0xff]  ;;  %v3463_v13 = vld [vmem:[#allocation11_spill] sm:$0xff] }
 0x237   :  { %902 = vmatprep.subr.mxu0 %v2243_v14  ;;  %973 = vmatprep.subr.mxu1 %v2245_v15  ;;  %v3464_v14 = vld [vmem:[#allocation12_spill] sm:$0xff]  ;;  %v3465_v15 = vld [vmem:[#allocation13_spill] sm:$0xff] }
 0x238   :  { %903 = vmatpush1.msra.mxu0 %v2251_v16  ;;  %974 = vmatpush1.msra.mxu1 %v2253_v17  ;;  %v3466_v16 = vld [vmem:[#allocation14_spill] sm:$0xff]  ;;  %v3467_v17 = vld [vmem:[#allocation15_spill] sm:$0xff] }
 0x239   :  { %904 = vmatprep.subr.mxu0 %v2262_v19  ;;  %975 = vmatprep.subr.mxu1 %v2264_v20  ;;  %v3468_v19 = vld [vmem:[#allocation16_spill] sm:$0xff]  ;;  %v3469_v20 = vld [vmem:[#allocation17_spill] sm:$0xff] }
 0x23a   :  { %905 = vmatpush1.msra.mxu0 %v2268_v21  ;;  %976 = vmatpush1.msra.mxu1 %v2270_v22  ;;  %v3470_v21 = vld [vmem:[#allocation18_spill] sm:$0xff]  ;;  %v3471_v22 = vld [vmem:[#allocation19_spill] sm:$0xff] }
 0x23b   :  { %906 = vmatprep.subr.mxu0 %v2274_v23  ;;  %977 = vmatprep.subr.mxu1 %v2276_v24  ;;  %v3472_v23 = vld [vmem:[#allocation20_spill] sm:$0xff]  ;;  %v3473_v24 = vld [vmem:[#allocation21_spill] sm:$0xff] }
 0x23c   :  { %907 = vmatpush1.msra.mxu0 %v2282_v25  ;;  %978 = vmatpush1.msra.mxu1 %v2284_v26  ;;  %v3474_v25 = vld [vmem:[#allocation22_spill] sm:$0xff]  ;;  %v3475_v26 = vld [vmem:[#allocation23_spill] sm:$0xff] }
 0x23d   :  { %908 = vmatprep.subr.mxu0 %v2293_v28  ;;  %979 = vmatprep.subr.mxu1 %v2295_v29  ;;  %v3476_v28 = vld [vmem:[#allocation24_spill] sm:$0xff]  ;;  %v3477_v29 = vld [vmem:[#allocation25_spill] sm:$0xff] }
 0x23e   :  { %909 = vmatpush1.msra.mxu0 %v2299_v30  ;;  %980 = vmatpush1.msra.mxu1 %v2301_v31  ;;  %v3478_v30 = vmov 0.0   ;;  %v3479_v31 = vld [vmem:[#allocation26_spill] sm:$0xff] }
 0x23f   :  { %910 = vmatprep.subr.mxu0 %v2305_v32  ;;  %981 = vmatprep.subr.mxu1 %v2307_v33  ;;  %v2780_v32 = vld [vmem:[#allocation2 + $0x1e8] sm:$0xff]  ;;  %v2783_v33 = vld [vmem:[#allocation2 + $0x1f8] sm:$0xff] }
 0x240   :  { %911 = vmatpush1.msra.mxu0 %v2313_v34  ;;  %982 = vmatpush1.msra.mxu1 %v2315_v35  ;;  %3480 = vst [vmem:[#allocation7_spill] sm:$0xff] %v2780_v32  ;;  %3481 = vst [vmem:[#allocation8_spill] sm:$0xff] %v2783_v33  ;;  %v3482_v35 = vld [vmem:[#allocation31_spill] sm:$0xff] }
 0x241   :  { %912 = vmatprep.subr.mxu0 %v2324_v37  ;;  %983 = vmatprep.subr.mxu1 %v2326_v38 }
 0x242   :  { %913 = vmatpush1.msra.mxu0 %v2330_v39  ;;  %984 = vmatpush1.msra.mxu1 %v2332_v40 }
 0x243   :  { %914 = vmatprep.subr.mxu0 %v2336_v41  ;;  %985 = vmatprep.subr.mxu1 %v2338_v42 }
 0x244   :  { %915 = vmatpush1.msra.mxu0 %v2344_v43  ;;  %986 = vmatpush1.msra.mxu1 %v2346_v44 }
 0x245   :  { %916 = vmatprep.subr.mxu0 %v2355_v46  ;;  %987 = vmatprep.subr.mxu1 %v2357_v47 }
 0x246   :  { %917 = vmatpush1.msra.mxu0 %v2361_v48  ;;  %988 = vmatpush1.msra.mxu1 %v2363_v49 }
 0x247   :  { %918 = vmatprep.subr.mxu0 %v2367_v50  ;;  %989 = vmatprep.subr.mxu1 %v2369_v51 }
 0x248   :  { %919 = vmatpush1.msra.mxu0 %v2375_v52  ;;  %990 = vmatpush1.msra.mxu1 %v2377_v53 }
 0x249   :  { %920 = vmatprep.subr.mxu0 %v2386_v55  ;;  %991 = vmatprep.subr.mxu1 %v2388_v56 }
 0x24a   :  { %921 = vmatpush1.msra.mxu0 %v2392_v57  ;;  %992 = vmatpush1.msra.mxu1 %v2394_v58 }
 0x24b   :  { %922 = vmatprep.subr.mxu0 %v3435_v27  ;;  %993 = vmatprep.subr.mxu1 %v3436_v6 }
 0x24c   :  { %923 = vmatpush1.msra.mxu0 %v3437_v36  ;;  %994 = vmatpush1.msra.mxu1 %v3462_v12 }
 0x24d   :  { %924 = vmatprep.subr.mxu0 %v3463_v13  ;;  %995 = vmatprep.subr.mxu1 %v3464_v14 }
 0x24e   :  { %925 = vmatpush1.msra.mxu0 %v3465_v15  ;;  %996 = vmatpush1.msra.mxu1 %v3466_v16 }
 0x24f   :  { %926 = vmatprep.subr.mxu0 %v3467_v17  ;;  %997 = vmatprep.subr.mxu1 %v3468_v19 }
 0x250   :  { %927 = vmatpush1.msra.mxu0 %v3469_v20  ;;  %998 = vmatpush1.msra.mxu1 %v3470_v21 }
 0x251   :  { %928 = vmatprep.subr.mxu0 %v3471_v22  ;;  %999 = vmatprep.subr.mxu1 %v3472_v23 }
 0x252   :  { %929 = vmatpush1.msra.mxu0 %v3473_v24  ;;  %1000 = vmatpush1.msra.mxu1 %v3474_v25 }
 0x253   :  { %930 = vmatprep.subr.mxu0 %v3475_v26  ;;  %1001 = vmatprep.subr.mxu1 %v3476_v28 }
 0x254   :  { %931 = vmatpush1.msra.mxu0 %v3477_v29  ;;  %964 = vmatprep.mubr.f32.mxu0 %v3478_v30 }
 0x255   :  { %1002 = vmatpush1.msra.mxu1 %v3479_v31  ;;  %1035 = vmatprep.mubr.f32.mxu1 %v3478_v30 }
 0x256   :  { %1070 = vmatprep.subr.mxu0 %v2780_v32  ;;  %1141 = vmatprep.subr.mxu1 %v2783_v33 }
 0x2f5   :  { %v796_v34 = vpop.f32.mrf.mxu0  ;;  %v867_v61 = vpop.f32.mrf.mxu1 }
 0x2f6   :  { %v872_v37 = vadd.f32 %v796_v34, %v3482_v35  ;;  %v874_v1 = vadd.f32 %v867_v61, %v3485_v63  ;;  %v2809_v63 = vld [vmem:[#allocation2 + $0x1d0] sm:$0xff] }
 0x2f7   :  { %v798_v38 = vpop.f32.mrf.mxu0  ;;  %v869_v3 = vpop.f32.mrf.mxu1 }
 0x2f8   :  { %v1871_v9 = vmul.f32 -1.442695, %v872_v37  ;;  %v873_v0 = vadd.f32 %v798_v38, %v3483_v54  ;;  %v875_v60 = vadd.f32 %v869_v3, %v3484_v2  ;;  %v2797_v3 = vld [vmem:[#allocation2 + $0x1f0] sm:$0xff]  ;;  %v2800_v2 = vld [vmem:[#allocation2 + $0x1c8] sm:$0xff] }
 0x2fa   :  { %1979 = vpow2.f32 %v1871_v9  ;;  %v1872_v45 = vmul.f32 -1.442695, %v873_v0  ;;  %v1873_v5 = vmul.f32 -1.442695, %v875_v60  ;;  %v2806_v60 = vld [vmem:[#allocation2 + $0x1c0] sm:$0xff] }
 0x2fc   :  { %1981 = vpow2.f32 %v1872_v45  ;;  %v2794_v45 = vld [vmem:[#allocation2 + $0x1e0] sm:$0xff] }
 0x2fd   :  { %1983 = vtanh.f32 %v874_v1  ;;  %v2812_v1 = vld [vmem:[#allocation2 + $0x1a8] sm:$0xff] }
 0x2fe   :  { %1985 = vpow2.f32 %v1873_v5  ;;  %v2815_v5 = vld [vmem:[#allocation2 + $0x1b8] sm:$0xff] }
 0x307   :  { %v1980_v62 = vpop.eup %1979 }
 0x308   :  { %v879_v59 = vadd.f32 1.0, %v1980_v62  ;;  %v2818_v62 = vld [vmem:[#allocation2 + $0x1a0] sm:$0xff] }
 0x309   :  { %v1982_v4 = vpop.eup %1981 }
 0x30a   :  { %1987 = vrcp.f32 %v879_v59  ;;  %v885_v11 = vadd.f32 1.0, %v1982_v4  ;;  %v1984_v10 = vpop.eup %1983  ;;  %v2821_v59 = vld [vmem:[#allocation2 + $0x1b0] sm:$0xff]  ;;  %v2824_v4 = vld [vmem:[#allocation2 + $0x188] sm:$0xff] }
 0x30b   :  { %v1986_v18 = vpop.eup %1985 }
 0x30c   :  { %1989 = vrcp.f32 %v885_v11  ;;  %v892_v37 = vadd.f32 1.0, %v1986_v18  ;;  %v2827_v11 = vld [vmem:[#allocation2 + $0x198] sm:$0xff]  ;;  %v2833_v18 = vld [vmem:[#allocation2 + $0x190] sm:$0xff] }
 0x30e   :  { %1991 = vrcp.f32 %v892_v37  ;;  %v2845_v37 = vld [vmem:[#allocation2 + $0x170] sm:$0xff] }
 0x30f   :  { %3487 = vst [vmem:[#allocation5_spill] sm:$0xff] %v2845_v37 }
 0x317   :  { %v1988_v8 = vpop.eup %1987 }
 0x318   :  { %v896_v34 = vmul.f32 %v1988_v8, %v1984_v10  ;;  %v2830_v10 = vld [vmem:[#allocation2 + $0x180] sm:$0xff]  ;;  %v2836_v8 = vld [vmem:[#allocation2 + $0x168] sm:$0xff] }
 0x319   :  { %v1990_v35 = vpop.eup %1989 }
 0x31a   :  { %v895_v38 = vmul.f32 %v1990_v35, %v2713_v7  ;;  %v2803_v7 = vld [vmem:[#allocation2 + $0x1d8] sm:$0xff]  ;;  %v2842_v35 = vld [vmem:[#allocation2 + $0x160] sm:$0xff] }
 0x31b   :  { %v1992_v54 = vpop.eup %1991  ;;  %3486 = vst [vmem:[#allocation9_spill] sm:$0xff] %v2842_v35 }
 0x31c   :  { %v2791_v9 = vadd.f32 %v896_v34, %v895_v38  ;;  %v2839_v34 = vld [vmem:[#allocation2 + $0x178] sm:$0xff]  ;;  %v2848_v38 = vld [vmem:[#allocation2 + $0x148] sm:$0xff] }
 0x31e   :  { %1993 = vtanh.f32 %v2791_v9 }
 0x32b   :  { %v1994_v0 = vpop.eup %1993 }
 0x32c   :  { %v899_v61 = vmul.f32 %v1994_v0, %v1992_v54  ;;  %v2851_v54 = vld [vmem:[#allocation2 + $0x158] sm:$0xff]  ;;  %v2854_v0 = vld [vmem:[#allocation2 + $0x140] sm:$0xff] }
 0x32e   :  { %965 = vmatmul.mubr.f32.vlgmr.msra.gmra.mxu0 %v899_v61  ;;  %1036 = vmatmul.mubr.f32.vlgmr.msra.gmra.mxu1 %v899_v61  ;;  %v2857_v61 = vld [vmem:[#allocation2 + $0x150] sm:$0xff] }
 0x32f   :  { %1071 = vmatpush1.msra.mxu0 %v2794_v45  ;;  %1142 = vmatpush1.msra.mxu1 %v2797_v3 }
 0x330   :  { %1072 = vmatprep.subr.mxu0 %v2800_v2  ;;  %1143 = vmatprep.subr.mxu1 %v2803_v7 }
 0x331   :  { %1073 = vmatpush1.msra.mxu0 %v2806_v60  ;;  %1144 = vmatpush1.msra.mxu1 %v2809_v63 }
 0x332   :  { %1074 = vmatprep.subr.mxu0 %v2812_v1  ;;  %1145 = vmatprep.subr.mxu1 %v2815_v5 }
 0x333   :  { %1075 = vmatpush1.msra.mxu0 %v2818_v62  ;;  %1146 = vmatpush1.msra.mxu1 %v2821_v59 }
 0x334   :  { %1076 = vmatprep.subr.mxu0 %v2824_v4  ;;  %1147 = vmatprep.subr.mxu1 %v2827_v11 }
 0x335   :  { %1077 = vmatpush1.msra.mxu0 %v2830_v10  ;;  %1148 = vmatpush1.msra.mxu1 %v2833_v18 }
 0x336   :  { %1078 = vmatprep.subr.mxu0 %v2836_v8  ;;  %1149 = vmatprep.subr.mxu1 %v2839_v34 }
 0x337   :  { %1079 = vmatpush1.msra.mxu0 %v2842_v35  ;;  %1150 = vmatpush1.msra.mxu1 %v2845_v37  ;;  %v2860_v35 = vld [vmem:[#allocation2 + $0x128] sm:$0xff]  ;;  %v2863_v37 = vld [vmem:[#allocation2 + $0x138] sm:$0xff] }
 0x338   :  { %1080 = vmatprep.subr.mxu0 %v2848_v38  ;;  %1151 = vmatprep.subr.mxu1 %v2851_v54 }
 0x339   :  { %1081 = vmatpush1.msra.mxu0 %v2854_v0  ;;  %1152 = vmatpush1.msra.mxu1 %v2857_v61 }
 0x33a   :  { %1082 = vmatprep.subr.mxu0 %v2860_v35  ;;  %1153 = vmatprep.subr.mxu1 %v2863_v37 }
 0x33b   :  { %1083 = vmatpush1.msra.mxu0 %v2330_v39  ;;  %1154 = vmatpush1.msra.mxu1 %v2332_v40  ;;  %v3488_v40 = vld [vmem:[#allocation35_spill] sm:$0xff] }
 0x33c   :  { %1084 = vmatprep.subr.mxu0 %v2336_v41  ;;  %1155 = vmatprep.subr.mxu1 %v2338_v42 }
 0x33d   :  { %1085 = vmatpush1.msra.mxu0 %v2344_v43  ;;  %1156 = vmatpush1.msra.mxu1 %v2346_v44  ;;  %v3489_v44 = vld [vmem:[#allocation37_spill] sm:$0xff] }
 0x33e   :  { %1086 = vmatprep.subr.mxu0 %v2355_v46  ;;  %1157 = vmatprep.subr.mxu1 %v2357_v47 }
 0x33f   :  { %1087 = vmatpush1.msra.mxu0 %v2361_v48  ;;  %1158 = vmatpush1.msra.mxu1 %v2363_v49 }
 0x340   :  { %1088 = vmatprep.subr.mxu0 %v2367_v50  ;;  %1159 = vmatprep.subr.mxu1 %v2369_v51  ;;  %v3490_v50 = vld [vmem:[#allocation38_spill] sm:$0xff] }
 0x341   :  { %1089 = vmatpush1.msra.mxu0 %v2375_v52  ;;  %1160 = vmatpush1.msra.mxu1 %v2377_v53  ;;  %v3491_v52 = vld [vmem:[#allocation36_spill] sm:$0xff] }
 0x342   :  { %1090 = vmatprep.subr.mxu0 %v2386_v55  ;;  %1161 = vmatprep.subr.mxu1 %v2388_v56 }
 0x343   :  { %1091 = vmatpush1.msra.mxu0 %v2392_v57  ;;  %1162 = vmatpush1.msra.mxu1 %v2394_v58 }
 0x344   :  { %1092 = vmatprep.subr.mxu0 %v3435_v27  ;;  %1163 = vmatprep.subr.mxu1 %v3436_v6 }
 0x345   :  { %1093 = vmatpush1.msra.mxu0 %v3437_v36  ;;  %1164 = vmatpush1.msra.mxu1 %v3462_v12 }
 0x346   :  { %1094 = vmatprep.subr.mxu0 %v3463_v13  ;;  %1165 = vmatprep.subr.mxu1 %v3464_v14 }
 0x347   :  { %1095 = vmatpush1.msra.mxu0 %v3465_v15  ;;  %1166 = vmatpush1.msra.mxu1 %v3466_v16 }
 0x348   :  { %1096 = vmatprep.subr.mxu0 %v3467_v17  ;;  %1167 = vmatprep.subr.mxu1 %v3468_v19 }
 0x349   :  { %1097 = vmatpush1.msra.mxu0 %v3469_v20  ;;  %1168 = vmatpush1.msra.mxu1 %v3470_v21 }
 0x34a   :  { %1098 = vmatprep.subr.mxu0 %v3471_v22  ;;  %1169 = vmatprep.subr.mxu1 %v3472_v23  ;;  %v3492_v22 = vld [vmem:[#allocation9_spill] sm:$0xff] }
 0x34b   :  { %1099 = vmatpush1.msra.mxu0 %v3473_v24  ;;  %1170 = vmatpush1.msra.mxu1 %v3474_v25  ;;  %v3493_v23 = vld [vmem:[#allocation5_spill] sm:$0xff]  ;;  %v2943_v25 = vld [vmem:[#allocation2 + $0x130] sm:$0xff] }
 0x34c   :  { %1100 = vmatprep.subr.mxu0 %v3475_v26  ;;  %1171 = vmatprep.subr.mxu1 %v3476_v28  ;;  %v2940_v24 = vld [vmem:[#allocation2 + $0x120] sm:$0xff]  ;;  %v2946_v26 = vld [vmem:[#allocation2 + $0x108] sm:$0xff]  ;;  %v2949_v28 = vld [vmem:[#allocation2 + $0x118] sm:$0xff] }
 0x34d   :  { %1101 = vmatpush1.msra.mxu0 %v3477_v29  ;;  %1134 = vmatprep.mubr.f32.mxu0 %v3478_v30  ;;  %v2952_v29 = vld [vmem:[#allocation2 + $0x100] sm:$0xff] }
 0x34e   :  { %1172 = vmatpush1.msra.mxu1 %v3479_v31  ;;  %1205 = vmatprep.mubr.f32.mxu1 %v3478_v30  ;;  %v2955_v31 = vld [vmem:[#allocation2 + $0x110] sm:$0xff] }
 0x34f   :  { %1240 = vmatprep.subr.mxu0 %v2780_v32  ;;  %1311 = vmatprep.subr.mxu1 %v2783_v33 }
 0x3ee   :  { %v966_v39 = vpop.f32.mrf.mxu0  ;;  %v1037_v47 = vpop.f32.mrf.mxu1 }
 0x3ef   :  { %v1042_v41 = vadd.f32 %v966_v39, %v3488_v40  ;;  %v1044_v53 = vadd.f32 %v1037_v47, %v3491_v52  ;;  %v2961_v39 = vld [vmem:[#allocation2 + $0xf8] sm:$0xff]  ;;  %v2964_v40 = vld [vmem:[#allocation2 + $0xe0] sm:$0xff]  ;;  %v2982_v47 = vld [vmem:[#allocation2 + $0xa8] sm:$0xff] }
 0x3f0   :  { %v968_v42 = vpop.f32.mrf.mxu0  ;;  %v1039_v49 = vpop.f32.mrf.mxu1  ;;  %v2997_v52 = vld [vmem:[#allocation2 + $0x98] sm:$0xff] }
 0x3f1   :  { %v1874_v43 = vmul.f32 -1.442695, %v1042_v41  ;;  %v1043_v46 = vadd.f32 %v968_v42, %v3489_v44  ;;  %v1045_v51 = vadd.f32 %v1039_v49, %v3490_v50  ;;  %v2967_v41 = vld [vmem:[#allocation2 + $0xf0] sm:$0xff]  ;;  %v2970_v42 = vld [vmem:[#allocation2 + $0xc8] sm:$0xff]  ;;  %v2976_v44 = vld [vmem:[#allocation2 + $0xc0] sm:$0xff] }
 0x3f2   :  { %v2988_v49 = vld [vmem:[#allocation2 + $0xa0] sm:$0xff]  ;;  %v2991_v50 = vld [vmem:[#allocation2 + $0xb0] sm:$0xff] }
 0x3f3   :  { %1995 = vpow2.f32 %v1874_v43  ;;  %v1875_v48 = vmul.f32 -1.442695, %v1043_v46  ;;  %v1876_v55 = vmul.f32 -1.442695, %v1045_v51  ;;  %v2973_v43 = vld [vmem:[#allocation2 + $0xd8] sm:$0xff]  ;;  %v2979_v46 = vld [vmem:[#allocation2 + $0xd0] sm:$0xff] }
 0x3f4   :  { %v2994_v51 = vld [vmem:[#allocation2 + $0x88] sm:$0xff] }
 0x3f5   :  { %1997 = vpow2.f32 %v1875_v48  ;;  %v2985_v48 = vld [vmem:[#allocation2 + $0xb8] sm:$0xff] }
 0x3f6   :  { %1999 = vtanh.f32 %v1044_v53  ;;  %v3000_v53 = vld [vmem:[#allocation2 + $0x80] sm:$0xff] }
 0x3f7   :  { %2001 = vpow2.f32 %v1876_v55  ;;  %v3003_v55 = vld [vmem:[#allocation2 + $0x90] sm:$0xff] }
 0x3f8   :  { %3494 = vst [vmem:[#allocation6_spill] sm:$0xff] %v3003_v55 }
 0x400   :  { %v1996_v56 = vpop.eup %1995 }
 0x401   :  { %v1049_v57 = vadd.f32 1.0, %v1996_v56  ;;  %v3006_v56 = vld [vmem:[#allocation2 + $0x68] sm:$0xff] }
 0x402   :  { %v1998_v58 = vpop.eup %1997  ;;  %3495 = vst [vmem:[#allocation27_spill] sm:$0xff] %v3006_v56 }
 0x403   :  { %2003 = vrcp.f32 %v1049_v57  ;;  %v1055_v27 = vadd.f32 1.0, %v1998_v58  ;;  %v2000_v6 = vpop.eup %1999  ;;  %v3009_v57 = vld [vmem:[#allocation2 + $0x78] sm:$0xff]  ;;  %v3012_v58 = vld [vmem:[#allocation2 + $0x60] sm:$0xff] }
 0x404   :  { %v2002_v36 = vpop.eup %2001  ;;  %3496 = vst [vmem:[#allocation29_spill] sm:$0xff] %v3009_v57  ;;  %3497 = vst [vmem:[#allocation30_spill] sm:$0xff] %v3012_v58 }
 0x405   :  { %2005 = vrcp.f32 %v1055_v27  ;;  %v1062_v15 = vadd.f32 1.0, %v2002_v36  ;;  %v3015_v27 = vld [vmem:[#allocation2 + $0x70] sm:$0xff]  ;;  %v3021_v36 = vld [vmem:[#allocation2 + $0x58] sm:$0xff] }
 0x406   :  { %3498 = vst [vmem:[#allocation28_spill] sm:$0xff] %v3015_v27  ;;  %3500 = vst [vmem:[#allocation11_spill] sm:$0xff] %v3021_v36 }
 0x407   :  { %2007 = vrcp.f32 %v1062_v15  ;;  %v3033_v15 = vld [vmem:[#allocation2 + $0x38] sm:$0xff] }
 0x408   :  { %3504 = vst [vmem:[#allocation15_spill] sm:$0xff] %v3033_v15 }
 0x410   :  { %v2004_v12 = vpop.eup %2003 }
 0x411   :  { %v1066_v13 = vmul.f32 %v2004_v12, %v2000_v6  ;;  %v3018_v6 = vld [vmem:[#allocation2 + $0x48] sm:$0xff]  ;;  %v3024_v12 = vld [vmem:[#allocation2 + $0x40] sm:$0xff] }
 0x412   :  { %v2006_v14 = vpop.eup %2005  ;;  %3499 = vst [vmem:[#allocation10_spill] sm:$0xff] %v3018_v6  ;;  %3501 = vst [vmem:[#allocation12_spill] sm:$0xff] %v3024_v12 }
 0x413   :  { %v1065_v16 = vmul.f32 %v2006_v14, %v2791_v9  ;;  %v2958_v9 = vld [vmem:[#allocation2 + $0xe8] sm:$0xff] }
 0x414   :  { %v2008_v19 = vpop.eup %2007  ;;  %v3030_v14 = vld [vmem:[#allocation2 + $0x28] sm:$0xff] }
 0x415   :  { %v2913_v17 = vadd.f32 %v1066_v13, %v1065_v16  ;;  %v3027_v13 = vld [vmem:[#allocation2 + $0x50] sm:$0xff]  ;;  %3503 = vst [vmem:[#allocation14_spill] sm:$0xff] %v3030_v14  ;;  %v3036_v16 = vld [vmem:[#allocation2 + $0x20] sm:$0xff] }
 0x416   :  { %3502 = vst [vmem:[#allocation13_spill] sm:$0xff] %v3027_v13  ;;  %3505 = vst [vmem:[#allocation16_spill] sm:$0xff] %v3036_v16 }
 0x417   :  { %2009 = vtanh.f32 %v2913_v17 }
 0x424   :  { %v2010_v20 = vpop.eup %2009 }
 0x425   :  { %v1069_v21 = vmul.f32 %v2010_v20, %v2008_v19  ;;  %v3039_v19 = vld [vmem:[#allocation2 + $0x30] sm:$0xff]  ;;  %v3042_v20 = vld [vmem:[#allocation2 + $0x8] sm:$0xff] }
 0x426   :  { %3506 = vst [vmem:[#allocation17_spill] sm:$0xff] %v3039_v19  ;;  %3507 = vst [vmem:[#allocation18_spill] sm:$0xff] %v3042_v20 }
 0x427   :  { %1135 = vmatmul.mubr.f32.vlgmr.msra.gmra.mxu0 %v1069_v21  ;;  %1206 = vmatmul.mubr.f32.vlgmr.msra.gmra.mxu1 %v1069_v21  ;;  %v3045_v21 = vld [vmem:[#allocation2 + $0x18] sm:$0xff] }
 0x428   :  { %1241 = vmatpush1.msra.mxu0 %v2794_v45  ;;  %1312 = vmatpush1.msra.mxu1 %v2797_v3  ;;  %3508 = vst [vmem:[#allocation19_spill] sm:$0xff] %v3045_v21 }
 0x429   :  { %1242 = vmatprep.subr.mxu0 %v2800_v2  ;;  %1313 = vmatprep.subr.mxu1 %v2803_v7 }
 0x42a   :  { %1243 = vmatpush1.msra.mxu0 %v2806_v60  ;;  %1314 = vmatpush1.msra.mxu1 %v2809_v63 }
 0x42b   :  { %1244 = vmatprep.subr.mxu0 %v2812_v1  ;;  %1315 = vmatprep.subr.mxu1 %v2815_v5 }
 0x42c   :  { %1245 = vmatpush1.msra.mxu0 %v2818_v62  ;;  %1316 = vmatpush1.msra.mxu1 %v2821_v59 }
 0x42d   :  { %1246 = vmatprep.subr.mxu0 %v2824_v4  ;;  %1317 = vmatprep.subr.mxu1 %v2827_v11 }
 0x42e   :  { %1247 = vmatpush1.msra.mxu0 %v2830_v10  ;;  %1318 = vmatpush1.msra.mxu1 %v2833_v18 }
 0x42f   :  { %1248 = vmatprep.subr.mxu0 %v2836_v8  ;;  %1319 = vmatprep.subr.mxu1 %v2839_v34 }
 0x430   :  { %1249 = vmatpush1.msra.mxu0 %v3492_v22  ;;  %1320 = vmatpush1.msra.mxu1 %v3493_v23 }
 0x431   :  { %1250 = vmatprep.subr.mxu0 %v2848_v38  ;;  %1321 = vmatprep.subr.mxu1 %v2851_v54 }
 0x432   :  { %1251 = vmatpush1.msra.mxu0 %v2854_v0  ;;  %1322 = vmatpush1.msra.mxu1 %v2857_v61 }
 0x433   :  { %1252 = vmatprep.subr.mxu0 %v2860_v35  ;;  %1323 = vmatprep.subr.mxu1 %v2863_v37 }
 0x434   :  { %1253 = vmatpush1.msra.mxu0 %v2940_v24  ;;  %1324 = vmatpush1.msra.mxu1 %v2943_v25 }
 0x435   :  { %1254 = vmatprep.subr.mxu0 %v2946_v26  ;;  %1325 = vmatprep.subr.mxu1 %v2949_v28 }
 0x436   :  { %1255 = vmatpush1.msra.mxu0 %v2952_v29  ;;  %1326 = vmatpush1.msra.mxu1 %v2955_v31 }
 0x437   :  { %1256 = vmatprep.subr.mxu0 %v2958_v9  ;;  %1327 = vmatprep.subr.mxu1 %v2961_v39 }
 0x438   :  { %1257 = vmatpush1.msra.mxu0 %v2964_v40  ;;  %1328 = vmatpush1.msra.mxu1 %v2967_v41 }
 0x439   :  { %1258 = vmatprep.subr.mxu0 %v2970_v42  ;;  %1329 = vmatprep.subr.mxu1 %v2973_v43 }
 0x43a   :  { %1259 = vmatpush1.msra.mxu0 %v2976_v44  ;;  %1330 = vmatpush1.msra.mxu1 %v2979_v46 }
 0x43b   :  { %1260 = vmatprep.subr.mxu0 %v2982_v47  ;;  %1331 = vmatprep.subr.mxu1 %v2985_v48 }
 0x43c   :  { %1261 = vmatpush1.msra.mxu0 %v2988_v49  ;;  %1332 = vmatpush1.msra.mxu1 %v2991_v50 }
 0x43d   :  { %1262 = vmatprep.subr.mxu0 %v2994_v51  ;;  %1333 = vmatprep.subr.mxu1 %v2997_v52 }
 0x43e   :  { %1263 = vmatpush1.msra.mxu0 %v3000_v53  ;;  %1334 = vmatpush1.msra.mxu1 %v3003_v55 }
 0x43f   :  { %1264 = vmatprep.subr.mxu0 %v3006_v56  ;;  %1335 = vmatprep.subr.mxu1 %v3009_v57  ;;  %v3514_v57 = vld [vmem:[#allocation40_spill] sm:$0xff] }
 0x440   :  { %1265 = vmatpush1.msra.mxu0 %v3012_v58  ;;  %1336 = vmatpush1.msra.mxu1 %v3015_v27  ;;  %v3513_v58 = vld [vmem:[#allocation42_spill] sm:$0xff] }
 0x441   :  { %1266 = vmatprep.subr.mxu0 %v3018_v6  ;;  %1337 = vmatprep.subr.mxu1 %v3021_v36 }
 0x442   :  { %1267 = vmatpush1.msra.mxu0 %v3024_v12  ;;  %1338 = vmatpush1.msra.mxu1 %v3027_v13  ;;  %v3512_v12 = vld [vmem:[#allocation41_spill] sm:$0xff] }
 0x443   :  { %1268 = vmatprep.subr.mxu0 %v3030_v14  ;;  %1339 = vmatprep.subr.mxu1 %v3033_v15  ;;  %v3048_v14 = vld [vmem:[#allocation2] sm:$0xff]  ;;  %v3052_v15 = vld [vmem:[#allocation2 + $0x10] sm:$0xff] }
 0x444   :  { %1269 = vmatpush1.msra.mxu0 %v3036_v16  ;;  %1340 = vmatpush1.msra.mxu1 %v3039_v19  ;;  %3509 = vst [vmem:[#allocation20_spill] sm:$0xff] %v3048_v14  ;;  %3510 = vst [vmem:[#allocation21_spill] sm:$0xff] %v3052_v15  ;;  %v3511_v19 = vld [vmem:[#allocation39_spill] sm:$0xff] }
 0x445   :  { %1270 = vmatprep.subr.mxu0 %v3042_v20  ;;  %1341 = vmatprep.subr.mxu1 %v3045_v21 }
 0x446   :  { %1271 = vmatpush1.msra.mxu0 %v3048_v14  ;;  %1304 = vmatprep.mubr.f32.mxu0 %v3478_v30 }
 0x447   :  { %1342 = vmatpush1.msra.mxu1 %v3052_v15  ;;  %1375 = vmatprep.mubr.f32.mxu1 %v3478_v30 }
 0x448   :  { %1410 = vmatprep.subr.mxu0 %v2780_v32  ;;  %1481 = vmatprep.subr.mxu1 %v2783_v33 }
 0x4e7   :  { %v1136_v20 = vpop.f32.mrf.mxu0  ;;  %v1207_v14 = vpop.f32.mrf.mxu1 }
 0x4e8   :  { %v1212_v16 = vadd.f32 %v1136_v20, %v3511_v19  ;;  %v1214_v30 = vadd.f32 %v1207_v14, %v3514_v57  ;;  %v3520_v14 = vld [vmem:[#allocation10_spill] sm:$0xff] }
 0x4e9   :  { %v1138_v21 = vpop.f32.mrf.mxu0  ;;  %v1209_v27 = vpop.f32.mrf.mxu1 }
 0x4ea   :  { %v1877_v13 = vmul.f32 -1.442695, %v1212_v16  ;;  %v1213_v36 = vadd.f32 %v1138_v21, %v3512_v12  ;;  %v1215_v15 = vadd.f32 %v1209_v27, %v3513_v58  ;;  %v3519_v27 = vld [vmem:[#allocation28_spill] sm:$0xff] }
 0x4ec   :  { %2011 = vpow2.f32 %v1877_v13  ;;  %v1878_v6 = vmul.f32 -1.442695, %v1213_v36  ;;  %v1879_v56 = vmul.f32 -1.442695, %v1215_v15  ;;  %v3521_v15 = vld [vmem:[#allocation11_spill] sm:$0xff] }
 0x4ee   :  { %2013 = vpow2.f32 %v1878_v6 }
 0x4ef   :  { %2015 = vtanh.f32 %v1214_v30 }
 0x4f0   :  { %2017 = vpow2.f32 %v1879_v56  ;;  %v3518_v56 = vld [vmem:[#allocation30_spill] sm:$0xff] }
 0x4f9   :  { %v2012_v32 = vpop.eup %2011 }
 0x4fa   :  { %v1219_v55 = vadd.f32 1.0, %v2012_v32 }
 0x4fb   :  { %v2014_v33 = vpop.eup %2013 }
 0x4fc   :  { %2019 = vrcp.f32 %v1219_v55  ;;  %v1225_v19 = vadd.f32 1.0, %v2014_v33  ;;  %v2016_v16 = vpop.eup %2015  ;;  %v3515_v33 = vld [vmem:[#allocation6_spill] sm:$0xff]  ;;  %v3517_v55 = vld [vmem:[#allocation29_spill] sm:$0xff] }
 0x4fd   :  { %v2018_v12 = vpop.eup %2017 }
 0x4fe   :  { %2021 = vrcp.f32 %v1225_v19  ;;  %v1232_v6 = vadd.f32 1.0, %v2018_v12  ;;  %v3522_v19 = vld [vmem:[#allocation12_spill] sm:$0xff]  ;;  %v3524_v12 = vld [vmem:[#allocation14_spill] sm:$0xff] }
 0x500   :  { %2023 = vrcp.f32 %v1232_v6  ;;  %v3528_v6 = vld [vmem:[#allocation18_spill] sm:$0xff] }
 0x509   :  { %v2020_v13 = vpop.eup %2019 }
 0x50a   :  { %v1236_v20 = vmul.f32 %v2020_v13, %v2016_v16  ;;  %v3523_v16 = vld [vmem:[#allocation13_spill] sm:$0xff]  ;;  %v3525_v13 = vld [vmem:[#allocation15_spill] sm:$0xff] }
 0x50b   :  { %v2022_v36 = vpop.eup %2021 }
 0x50c   :  { %v1235_v21 = vmul.f32 %v2022_v36, %v2913_v17  ;;  %v3516_v17 = vld [vmem:[#allocation27_spill] sm:$0xff]  ;;  %v3527_v36 = vld [vmem:[#allocation17_spill] sm:$0xff] }
 0x50d   :  { %v2024_v32 = vpop.eup %2023 }
 0x50e   :  { %v3063_v58 = vadd.f32 %v1236_v20, %v1235_v21  ;;  %v3526_v20 = vld [vmem:[#allocation16_spill] sm:$0xff]  ;;  %v3529_v21 = vld [vmem:[#allocation19_spill] sm:$0xff] }
 0x510   :  { %2025 = vtanh.f32 %v3063_v58 }
 0x51d   :  { %v2026_v30 = vpop.eup %2025 }
 0x51e   :  { %v1239_v57 = vmul.f32 %v2026_v30, %v2024_v32  ;;  %v3530_v32 = vld [vmem:[#allocation20_spill] sm:$0xff]  ;;  %v3531_v30 = vmov 0.0  }
 0x520   :  { %1305 = vmatmul.mubr.f32.vlgmr.msra.gmra.mxu0 %v1239_v57  ;;  %1376 = vmatmul.mubr.f32.vlgmr.msra.gmra.mxu1 %v1239_v57  ;;  %v3532_v57 = vld [vmem:[#allocation21_spill] sm:$0xff] }
 0x521   :  { %1411 = vmatpush1.msra.mxu0 %v2794_v45  ;;  %1482 = vmatpush1.msra.mxu1 %v2797_v3 }
 0x522   :  { %1412 = vmatprep.subr.mxu0 %v2800_v2  ;;  %1483 = vmatprep.subr.mxu1 %v2803_v7 }
 0x523   :  { %1413 = vmatpush1.msra.mxu0 %v2806_v60  ;;  %1484 = vmatpush1.msra.mxu1 %v2809_v63 }
 0x524   :  { %1414 = vmatprep.subr.mxu0 %v2812_v1  ;;  %1485 = vmatprep.subr.mxu1 %v2815_v5 }
 0x525   :  { %1415 = vmatpush1.msra.mxu0 %v2818_v62  ;;  %1486 = vmatpush1.msra.mxu1 %v2821_v59 }
 0x526   :  { %1416 = vmatprep.subr.mxu0 %v2824_v4  ;;  %1487 = vmatprep.subr.mxu1 %v2827_v11 }
 0x527   :  { %1417 = vmatpush1.msra.mxu0 %v2830_v10  ;;  %1488 = vmatpush1.msra.mxu1 %v2833_v18 }
 0x528   :  { %1418 = vmatprep.subr.mxu0 %v2836_v8  ;;  %1489 = vmatprep.subr.mxu1 %v2839_v34 }
 0x529   :  { %1419 = vmatpush1.msra.mxu0 %v3492_v22  ;;  %1490 = vmatpush1.msra.mxu1 %v3493_v23 }
 0x52a   :  { %1420 = vmatprep.subr.mxu0 %v2848_v38  ;;  %1491 = vmatprep.subr.mxu1 %v2851_v54 }
 0x52b   :  { %1421 = vmatpush1.msra.mxu0 %v2854_v0  ;;  %1492 = vmatpush1.msra.mxu1 %v2857_v61 }
 0x52c   :  { %1422 = vmatprep.subr.mxu0 %v2860_v35  ;;  %1493 = vmatprep.subr.mxu1 %v2863_v37 }
 0x52d   :  { %1423 = vmatpush1.msra.mxu0 %v2940_v24  ;;  %1494 = vmatpush1.msra.mxu1 %v2943_v25 }
 0x52e   :  { %1424 = vmatprep.subr.mxu0 %v2946_v26  ;;  %1495 = vmatprep.subr.mxu1 %v2949_v28 }
 0x52f   :  { %1425 = vmatpush1.msra.mxu0 %v2952_v29  ;;  %1496 = vmatpush1.msra.mxu1 %v2955_v31 }
 0x530   :  { %1426 = vmatprep.subr.mxu0 %v2958_v9  ;;  %1497 = vmatprep.subr.mxu1 %v2961_v39 }
 0x531   :  { %1427 = vmatpush1.msra.mxu0 %v2964_v40  ;;  %1498 = vmatpush1.msra.mxu1 %v2967_v41 }
 0x532   :  { %1428 = vmatprep.subr.mxu0 %v2970_v42  ;;  %1499 = vmatprep.subr.mxu1 %v2973_v43 }
 0x533   :  { %1429 = vmatpush1.msra.mxu0 %v2976_v44  ;;  %1500 = vmatpush1.msra.mxu1 %v2979_v46 }
 0x534   :  { %1430 = vmatprep.subr.mxu0 %v2982_v47  ;;  %1501 = vmatprep.subr.mxu1 %v2985_v48 }
 0x535   :  { %1431 = vmatpush1.msra.mxu0 %v2988_v49  ;;  %1502 = vmatpush1.msra.mxu1 %v2991_v50 }
 0x536   :  { %1432 = vmatprep.subr.mxu0 %v2994_v51  ;;  %1503 = vmatprep.subr.mxu1 %v2997_v52 }
 0x537   :  { %1433 = vmatpush1.msra.mxu0 %v3000_v53  ;;  %1504 = vmatpush1.msra.mxu1 %v3515_v33 }
 0x538   :  { %1434 = vmatprep.subr.mxu0 %v3516_v17  ;;  %1505 = vmatprep.subr.mxu1 %v3517_v55  ;;  %v3538_v55 = vld [vmem:[#allocation44_spill] sm:$0xff] }
 0x539   :  { %1435 = vmatpush1.msra.mxu0 %v3518_v56  ;;  %1506 = vmatpush1.msra.mxu1 %v3519_v27  ;;  %v3537_v56 = vld [vmem:[#allocation46_spill] sm:$0xff] }
 0x53a   :  { %1436 = vmatprep.subr.mxu0 %v3520_v14  ;;  %1507 = vmatprep.subr.mxu1 %v3521_v15 }
 0x53b   :  { %1437 = vmatpush1.msra.mxu0 %v3522_v19  ;;  %1508 = vmatpush1.msra.mxu1 %v3523_v16  ;;  %v3533_v16 = vld [vmem:[#allocation7_spill] sm:$0xff] }
 0x53c   :  { %1438 = vmatprep.subr.mxu0 %v3524_v12  ;;  %1509 = vmatprep.subr.mxu1 %v3525_v13  ;;  %v3534_v12 = vld [vmem:[#allocation8_spill] sm:$0xff] }
 0x53d   :  { %1439 = vmatpush1.msra.mxu0 %v3526_v20  ;;  %1510 = vmatpush1.msra.mxu1 %v3527_v36  ;;  %v3535_v20 = vld [vmem:[#allocation43_spill] sm:$0xff] }
 0x53e   :  { %1440 = vmatprep.subr.mxu0 %v3528_v6  ;;  %1511 = vmatprep.subr.mxu1 %v3529_v21  ;;  %v3536_v6 = vld [vmem:[#allocation45_spill] sm:$0xff] }
 0x53f   :  { %1441 = vmatpush1.msra.mxu0 %v3530_v32  ;;  %1474 = vmatprep.mubr.f32.mxu0 %v3531_v30 }
 0x540   :  { %1512 = vmatpush1.msra.mxu1 %v3532_v57  ;;  %1545 = vmatprep.mubr.f32.mxu1 %v3531_v30 }
 0x541   :  { %1580 = vmatprep.subr.mxu0 %v3533_v16  ;;  %1651 = vmatprep.subr.mxu1 %v3534_v12 }
 0x5e0   :  { %v1306_v13 = vpop.f32.mrf.mxu0  ;;  %v1377_v21 = vpop.f32.mrf.mxu1 }
 0x5e1   :  { %v1382_v19 = vadd.f32 %v1306_v13, %v3535_v20  ;;  %v1384_v30 = vadd.f32 %v1377_v21, %v3538_v55 }
 0x5e2   :  { %v1308_v36 = vpop.f32.mrf.mxu0  ;;  %v1379_v27 = vpop.f32.mrf.mxu1 }
 0x5e3   :  { %v1880_v15 = vmul.f32 -1.442695, %v1382_v19  ;;  %v1383_v14 = vadd.f32 %v1308_v36, %v3536_v6  ;;  %v1385_v57 = vadd.f32 %v1379_v27, %v3537_v56 }
 0x5e5   :  { %2027 = vpow2.f32 %v1880_v15  ;;  %v1881_v32 = vmul.f32 -1.442695, %v1383_v14  ;;  %v1882_v17 = vmul.f32 -1.442695, %v1385_v57  ;;  %v1764_v57 = vld [vmem:[%s3292_s4 + $0x70] sm:$0xff] }
 0x5e7   :  { %2029 = vpow2.f32 %v1881_v32 }
 0x5e8   :  { %2031 = vtanh.f32 %v1384_v30  ;;  %v1765_v30 = vld [vmem:[%s3292_s4 + $0x78] sm:$0xff] }
 0x5e9   :  { %2033 = vpow2.f32 %v1882_v17 }
 0x5f2   :  { %v2028_v16 = vpop.eup %2027 }
 0x5f3   :  { %v1389_v33 = vadd.f32 1.0, %v2028_v16  ;;  %v1763_v16 = vld [vmem:[%s3292_s4 + $0x68] sm:$0xff] }
 0x5f4   :  { %v2030_v12 = vpop.eup %2029 }
 0x5f5   :  { %2035 = vrcp.f32 %v1389_v33  ;;  %v1395_v13 = vadd.f32 1.0, %v2030_v12  ;;  %v2032_v19 = vpop.eup %2031  ;;  %v1762_v12 = vld [vmem:[%s3292_s4 + $0x60] sm:$0xff] }
 0x5f6   :  { %v2034_v20 = vpop.eup %2033 }
 0x5f7   :  { %2037 = vrcp.f32 %v1395_v13  ;;  %v1402_v6 = vadd.f32 1.0, %v2034_v20  ;;  %v1761_v13 = vld [vmem:[%s3292_s4 + $0x58] sm:$0xff]  ;;  %v1759_v20 = vld [vmem:[%s3292_s4 + $0x48] sm:$0xff] }
 0x5f9   :  { %2039 = vrcp.f32 %v1402_v6  ;;  %v1755_v6 = vld [vmem:[%s3292_s4 + $0x28] sm:$0xff] }
 0x602   :  { %v2036_v15 = vpop.eup %2035 }
 0x603   :  { %v1406_v36 = vmul.f32 %v2036_v15, %v2032_v19  ;;  %v1760_v19 = vld [vmem:[%s3292_s4 + $0x50] sm:$0xff]  ;;  %v1758_v15 = vld [vmem:[%s3292_s4 + $0x40] sm:$0xff] }
 0x604   :  { %v2038_v14 = vpop.eup %2037 }
 0x605   :  { %v1405_v32 = vmul.f32 %v2038_v14, %v3063_v58  ;;  %v1756_v14 = vld [vmem:[%s3292_s4 + $0x30] sm:$0xff] }
 0x606   :  { %v2040_v55 = vpop.eup %2039 }
 0x607   :  { %v3137_v56 = vadd.f32 %v1406_v36, %v1405_v32  ;;  %v1757_v36 = vld [vmem:[%s3292_s4 + $0x38] sm:$0xff]  ;;  %v1754_v32 = vld [vmem:[%s3292_s4 + $0x20] sm:$0xff] }
 0x609   :  { %2041 = vtanh.f32 %v3137_v56 }
 0x616   :  { %v2042_v27 = vpop.eup %2041 }
 0x617   :  { %v1409_v21 = vmul.f32 %v2042_v27, %v2040_v55  ;;  %v1752_v55 = vld [vmem:[%s3292_s4 + $0x10] sm:$0xff]  ;;  %v1751_v27 = vld [vmem:[%s3292_s4 + $0x8] sm:$0xff] }
 0x619   :  { %1475 = vmatmul.mubr.f32.vlgmr.msra.gmra.mxu0 %v1409_v21  ;;  %1546 = vmatmul.mubr.f32.vlgmr.msra.gmra.mxu1 %v1409_v21  ;;  %v1750_v21 = vld [vmem:[%s3292_s4] sm:$0xff] }
 0x61a   :  { %1581 = vmatpush1.msra.mxu0 %v2794_v45  ;;  %1652 = vmatpush1.msra.mxu1 %v2797_v3  ;;  %v3539_v45 = vld [vmem:[#allocation6_spill] sm:$0xff]  ;;  %v3540_v3 = vld [vmem:[#allocation27_spill] sm:$0xff] }
 0x61b   :  { %1582 = vmatprep.subr.mxu0 %v2800_v2  ;;  %1653 = vmatprep.subr.mxu1 %v2803_v7  ;;  %v3541_v2 = vld [vmem:[#allocation29_spill] sm:$0xff]  ;;  %v3542_v7 = vld [vmem:[#allocation30_spill] sm:$0xff] }
 0x61c   :  { %1583 = vmatpush1.msra.mxu0 %v2806_v60  ;;  %1654 = vmatpush1.msra.mxu1 %v2809_v63  ;;  %v3543_v60 = vld [vmem:[#allocation28_spill] sm:$0xff]  ;;  %v3544_v63 = vld [vmem:[#allocation10_spill] sm:$0xff] }
 0x61d   :  { %1584 = vmatprep.subr.mxu0 %v2812_v1  ;;  %1655 = vmatprep.subr.mxu1 %v2815_v5  ;;  %v3545_v1 = vld [vmem:[#allocation11_spill] sm:$0xff]  ;;  %v3546_v5 = vld [vmem:[#allocation12_spill] sm:$0xff] }
 0x61e   :  { %1585 = vmatpush1.msra.mxu0 %v2818_v62  ;;  %1656 = vmatpush1.msra.mxu1 %v2821_v59  ;;  %v3547_v62 = vld [vmem:[#allocation13_spill] sm:$0xff]  ;;  %v3548_v59 = vld [vmem:[#allocation14_spill] sm:$0xff] }
 0x61f   :  { %1586 = vmatprep.subr.mxu0 %v2824_v4  ;;  %1657 = vmatprep.subr.mxu1 %v2827_v11  ;;  %v3549_v4 = vld [vmem:[#allocation15_spill] sm:$0xff]  ;;  %v3550_v11 = vld [vmem:[#allocation16_spill] sm:$0xff] }
 0x620   :  { %1587 = vmatpush1.msra.mxu0 %v2830_v10  ;;  %1658 = vmatpush1.msra.mxu1 %v2833_v18  ;;  %v3551_v10 = vld [vmem:[#allocation17_spill] sm:$0xff]  ;;  %v3552_v18 = vld [vmem:[#allocation18_spill] sm:$0xff] }
 0x621   :  { %1588 = vmatprep.subr.mxu0 %v2836_v8  ;;  %1659 = vmatprep.subr.mxu1 %v2839_v34  ;;  %v3553_v8 = vld [vmem:[#allocation19_spill] sm:$0xff]  ;;  %v3554_v34 = vld [vmem:[#allocation20_spill] sm:$0xff] }
 0x622   :  { %1589 = vmatpush1.msra.mxu0 %v3492_v22  ;;  %1660 = vmatpush1.msra.mxu1 %v3493_v23  ;;  %v3558_v23 = vld [vmem:[#allocation49_spill] sm:$0xff] }
 0x623   :  { %1590 = vmatprep.subr.mxu0 %v2848_v38  ;;  %1661 = vmatprep.subr.mxu1 %v2851_v54  ;;  %v3557_v54 = vld [vmem:[#allocation47_spill] sm:$0xff] }
 0x624   :  { %1591 = vmatpush1.msra.mxu0 %v2854_v0  ;;  %1662 = vmatpush1.msra.mxu1 %v2857_v61 }
 0x625   :  { %1592 = vmatprep.subr.mxu0 %v2860_v35  ;;  %1663 = vmatprep.subr.mxu1 %v2863_v37  ;;  %v3555_v35 = vmov 0.0   ;;  %v3556_v37 = vld [vmem:[#allocation21_spill] sm:$0xff] }
 0x626   :  { %1593 = vmatpush1.msra.mxu0 %v2940_v24  ;;  %1664 = vmatpush1.msra.mxu1 %v2943_v25 }
 0x627   :  { %1594 = vmatprep.subr.mxu0 %v2946_v26  ;;  %1665 = vmatprep.subr.mxu1 %v2949_v28 }
 0x628   :  { %1595 = vmatpush1.msra.mxu0 %v2952_v29  ;;  %1666 = vmatpush1.msra.mxu1 %v2955_v31  ;;  %v3559_v29 = vld [vmem:[#allocation50_spill] sm:$0xff] }
 0x629   :  { %1596 = vmatprep.subr.mxu0 %v2958_v9  ;;  %1667 = vmatprep.subr.mxu1 %v2961_v39  ;;  %v3560_v9 = vld [vmem:[#allocation48_spill] sm:$0xff] }
 0x62a   :  { %1597 = vmatpush1.msra.mxu0 %v2964_v40  ;;  %1668 = vmatpush1.msra.mxu1 %v2967_v41 }
 0x62b   :  { %1598 = vmatprep.subr.mxu0 %v2970_v42  ;;  %1669 = vmatprep.subr.mxu1 %v2973_v43 }
 0x62c   :  { %1599 = vmatpush1.msra.mxu0 %v2976_v44  ;;  %1670 = vmatpush1.msra.mxu1 %v2979_v46 }
 0x62d   :  { %1600 = vmatprep.subr.mxu0 %v2982_v47  ;;  %1671 = vmatprep.subr.mxu1 %v2985_v48 }
 0x62e   :  { %1601 = vmatpush1.msra.mxu0 %v2988_v49  ;;  %1672 = vmatpush1.msra.mxu1 %v2991_v50 }
 0x62f   :  { %1602 = vmatprep.subr.mxu0 %v2994_v51  ;;  %1673 = vmatprep.subr.mxu1 %v2997_v52 }
 0x630   :  { %1603 = vmatpush1.msra.mxu0 %v3000_v53  ;;  %1674 = vmatpush1.msra.mxu1 %v3539_v45 }
 0x631   :  { %1604 = vmatprep.subr.mxu0 %v3540_v3  ;;  %1675 = vmatprep.subr.mxu1 %v3541_v2  ;;  %v3561_v3 = vld [vmem:[#allocation51_spill] sm:$0xff] }
 0x632   :  { %1605 = vmatpush1.msra.mxu0 %v3542_v7  ;;  %1676 = vmatpush1.msra.mxu1 %v3543_v60 }
 0x633   :  { %1606 = vmatprep.subr.mxu0 %v3544_v63  ;;  %1677 = vmatprep.subr.mxu1 %v3545_v1  ;;  %v3562_v63 = vld [vmem:[#allocation53_spill] sm:$0xff] }
 0x634   :  { %1607 = vmatpush1.msra.mxu0 %v3546_v5  ;;  %1678 = vmatpush1.msra.mxu1 %v3547_v62 }
 0x635   :  { %1608 = vmatprep.subr.mxu0 %v3548_v59  ;;  %1679 = vmatprep.subr.mxu1 %v3549_v4  ;;  %v3563_v4 = vld [vmem:[#allocation54_spill] sm:$0xff] }
 0x636   :  { %1609 = vmatpush1.msra.mxu0 %v3550_v11  ;;  %1680 = vmatpush1.msra.mxu1 %v3551_v10  ;;  %v3564_v10 = vld [vmem:[#allocation52_spill] sm:$0xff] }
 0x637   :  { %1610 = vmatprep.subr.mxu0 %v3552_v18  ;;  %1681 = vmatprep.subr.mxu1 %v3553_v8 }
 0x638   :  { %1611 = vmatpush1.msra.mxu0 %v3554_v34  ;;  %1644 = vmatprep.mubr.f32.mxu0 %v3555_v35 }
 0x639   :  { %1682 = vmatpush1.msra.mxu1 %v3556_v37  ;;  %1715 = vmatprep.mubr.f32.mxu1 %v3555_v35 }
 0x63a   :  { %1907 = vmatprep.subr.mxu0 %v3555_v35 }
 0x6d9   :  { %v1476_v38 = vpop.f32.mrf.mxu0  ;;  %v1547_v25 = vpop.f32.mrf.mxu1 }
 0x6da   :  { %v1552_v0 = vadd.f32 %v1476_v38, %v3557_v54  ;;  %v1554_v39 = vadd.f32 %v1547_v25, %v3560_v9  ;;  %v1889_v9 = vld [vmem:[%s3293_s5] ss:$0 sm:$0xff] }
 0x6db   :  { %v1478_v61 = vpop.f32.mrf.mxu0  ;;  %v1549_v28 = vpop.f32.mrf.mxu1 }
 0x6dc   :  { %v1883_v22 = vmul.f32 -1.442695, %v1552_v0  ;;  %v1553_v24 = vadd.f32 %v1478_v61, %v3558_v23  ;;  %v1555_v31 = vadd.f32 %v1549_v28, %v3559_v29 }
 0x6de   :  { %2043 = vpow2.f32 %v1883_v22  ;;  %v1884_v26 = vmul.f32 -1.442695, %v1553_v24  ;;  %v1885_v40 = vmul.f32 -1.442695, %v1555_v31 }
 0x6e0   :  { %2045 = vpow2.f32 %v1884_v26 }
 0x6e1   :  { %2047 = vtanh.f32 %v1554_v39 }
 0x6e2   :  { %2049 = vpow2.f32 %v1885_v40 }
 0x6eb   :  { %v2044_v41 = vpop.eup %2043 }
 0x6ec   :  { %v1559_v42 = vadd.f32 1.0, %v2044_v41 }
 0x6ed   :  { %v2046_v43 = vpop.eup %2045 }
 0x6ee   :  { %2051 = vrcp.f32 %v1559_v42  ;;  %v1565_v44 = vadd.f32 1.0, %v2046_v43  ;;  %v2048_v46 = vpop.eup %2047 }
 0x6ef   :  { %v2050_v47 = vpop.eup %2049 }
 0x6f0   :  { %2053 = vrcp.f32 %v1565_v44  ;;  %v1572_v51 = vadd.f32 1.0, %v2050_v47 }
 0x6f2   :  { %2055 = vrcp.f32 %v1572_v51 }
 0x6fb   :  { %v2052_v48 = vpop.eup %2051 }
 0x6fc   :  { %v1576_v49 = vmul.f32 %v2052_v48, %v2048_v46 }
 0x6fd   :  { %v2054_v50 = vpop.eup %2053 }
 0x6fe   :  { %v1575_v52 = vmul.f32 %v2054_v50, %v3137_v56  ;;  %v1753_v56 = vld [vmem:[%s3292_s4 + $0x18] sm:$0xff] }
 0x6ff   :  { %v2056_v58 = vpop.eup %2055 }
 0x700   :  { %v3210_v53 = vadd.f32 %v1576_v49, %v1575_v52 }
 0x702   :  { %2057 = vtanh.f32 %v3210_v53 }
 0x70f   :  { %v2058_v33 = vpop.eup %2057 }
 0x710   :  { %v1579_v17 = vmul.f32 %v2058_v33, %v2056_v58 }
 0x712   :  { %1645 = vmatmul.mubr.f32.vlgmr.msra.gmra.mxu0 %v1579_v17  ;;  %1716 = vmatmul.mubr.f32.vlgmr.msra.gmra.mxu1 %v1579_v17 }
 0x713   :  { %1908 = vmatpush3.msra.mxu0 %v1765_v30  ;;  %1939 = vmatprep.mubr.msk.f32.mxu0 %vm2165_vm1, %v3555_v35 }
 0x714   :  { %1909 = vmatprep.subr.mxu0 %v3555_v35 }
 0x715   :  { %1910 = vmatpush3.msra.mxu0 %v1764_v57 }
 0x716   :  { %1911 = vmatprep.subr.mxu0 %v3555_v35 }
 0x717   :  { %1912 = vmatpush3.msra.mxu0 %v1763_v16 }
 0x718   :  { %1913 = vmatprep.subr.mxu0 %v3555_v35 }
 0x719   :  { %1914 = vmatpush3.msra.mxu0 %v1762_v12 }
 0x71a   :  { %1915 = vmatprep.subr.mxu0 %v3555_v35 }
 0x71b   :  { %1916 = vmatpush3.msra.mxu0 %v1761_v13 }
 0x71c   :  { %1917 = vmatprep.subr.mxu0 %v3555_v35 }
 0x71d   :  { %1918 = vmatpush3.msra.mxu0 %v1760_v19 }
 0x71e   :  { %1919 = vmatprep.subr.mxu0 %v3555_v35 }
 0x71f   :  { %1920 = vmatpush3.msra.mxu0 %v1759_v20 }
 0x720   :  { %1921 = vmatprep.subr.mxu0 %v3555_v35 }
 0x721   :  { %1922 = vmatpush3.msra.mxu0 %v1758_v15 }
 0x722   :  { %1923 = vmatprep.subr.mxu0 %v3555_v35 }
 0x723   :  { %1924 = vmatpush3.msra.mxu0 %v1757_v36 }
 0x724   :  { %1925 = vmatprep.subr.mxu0 %v3555_v35 }
 0x725   :  { %1926 = vmatpush3.msra.mxu0 %v1756_v14 }
 0x726   :  { %1927 = vmatprep.subr.mxu0 %v3555_v35 }
 0x727   :  { %1928 = vmatpush3.msra.mxu0 %v1755_v6 }
 0x728   :  { %1929 = vmatprep.subr.mxu0 %v3555_v35 }
 0x729   :  { %1930 = vmatpush3.msra.mxu0 %v1754_v32 }
 0x72a   :  { %1931 = vmatprep.subr.mxu0 %v3555_v35 }
 0x72b   :  { %1932 = vmatpush3.msra.mxu0 %v1753_v56 }
 0x72c   :  { %1933 = vmatprep.subr.mxu0 %v3555_v35 }
 0x72d   :  { %1934 = vmatpush3.msra.mxu0 %v1752_v55 }
 0x72e   :  { %1935 = vmatprep.subr.mxu0 %v3555_v35 }
 0x72f   :  { %1936 = vmatpush3.msra.mxu0 %v1751_v27 }
 0x730   :  { %1937 = vmatprep.subr.mxu0 %v3555_v35 }
 0x731   :  { %1938 = vmatpush3.msra.mxu0 %v1750_v21 }
 0x7d2   :  { %v1646_v45 = vpop.f32.mrf.mxu0  ;;  %v1717_v5 = vpop.f32.mrf.mxu1 }
 0x7d3   :  { %v1722_v2 = vadd.f32 %v1646_v45, %v3561_v3  ;;  %v1724_v18 = vadd.f32 %v1717_v5, %v3564_v10 }
 0x7d4   :  { %v1648_v7 = vpop.f32.mrf.mxu0  ;;  %v1719_v59 = vpop.f32.mrf.mxu1 }
 0x7d5   :  { %v1886_v60 = vmul.f32 -1.442695, %v1722_v2  ;;  %v1723_v1 = vadd.f32 %v1648_v7, %v3562_v63  ;;  %v1725_v11 = vadd.f32 %v1719_v59, %v3563_v4 }
 0x7d7   :  { %2059 = vpow2.f32 %v1886_v60  ;;  %v1887_v62 = vmul.f32 -1.442695, %v1723_v1  ;;  %v1888_v8 = vmul.f32 -1.442695, %v1725_v11 }
 0x7d9   :  { %2061 = vpow2.f32 %v1887_v62 }
 0x7da   :  { %2063 = vtanh.f32 %v1724_v18 }
 0x7db   :  { %2065 = vpow2.f32 %v1888_v8 }
 0x7e4   :  { %v2060_v34 = vpop.eup %2059 }
 0x7e5   :  { %v1729_v35 = vadd.f32 1.0, %v2060_v34 }
 0x7e6   :  { %v2062_v37 = vpop.eup %2061 }
 0x7e7   :  { %2067 = vrcp.f32 %v1729_v35  ;;  %v1735_v38 = vadd.f32 1.0, %v2062_v37  ;;  %v2064_v54 = vpop.eup %2063 }
 0x7e8   :  { %v2066_v0 = vpop.eup %2065 }
 0x7e9   :  { %2069 = vrcp.f32 %v1735_v38  ;;  %v1742_v24 = vadd.f32 1.0, %v2066_v0 }
 0x7eb   :  { %2071 = vrcp.f32 %v1742_v24 }
 0x7f4   :  { %v2068_v61 = vpop.eup %2067 }
 0x7f5   :  { %v1746_v22 = vmul.f32 %v2068_v61, %v2064_v54 }
 0x7f6   :  { %v2070_v23 = vpop.eup %2069 }
 0x7f7   :  { %v1745_v25 = vmul.f32 %v2070_v23, %v3210_v53 }
 0x7f8   :  { %v2072_v28 = vpop.eup %2071 }
 0x7f9   :  { %v1747_v26 = vadd.f32 %v1746_v22, %v1745_v25 }
 0x7fb   :  { %2073 = vtanh.f32 %v1747_v26 }
 0x808   :  { %v2074_v29 = vpop.eup %2073 }
 0x809   :  { %v1749_v31 = vmul.f32 %v2074_v29, %v2072_v28 }
 0x80b   :  { %1940 = vmatmul.mubr.f32.vlgmr.msra.gmra.mxu0 %v1749_v31 }
 0x8cb   :  { %v1839_v39 = vpop.f32.mrf.mxu0 }
 0x8cc   :  { %v1840_v40 = vadd.f32 %v1889_v9, %v1839_v39 }
 0x8cd   :  { %v1941_v41 = vpop.f32.mrf.mxu0 }
 0x8ce   :  { %1843 = vst [vmem:[%s3294_s6] sm:$0xff] %v1840_v40 }
 0x8cf   :  { %1848 = vsyncpa [#allocation3], 1 }

</bundles_post_ra>
